<compile_context>
chip_gen: v5e
topology: v5e:2x2
jax: 0.10.0
libtpu: 0.0.40
codegen_flags: <defaults>
</compile_context>

<pallas_src>
import functools

import jax
import jax.numpy as jnp
from jax.experimental import pallas as pl
from jax.experimental.pallas import tpu as pltpu

HIDDEN_LAYER_SIZE = 1024


def _round_up(x, m):
    return ((x + m - 1) // m) * m


def _pick_tm(m, cap=512):
    """Row-tile: multiple of 8, big enough to cover small M, capped at 512."""
    return max(8, min(cap, _round_up(m, 8)))


# ----------------------------------------------------------------------------
# Pallas kernel 1: fused  out = [relu](x @ w + b)   (used for the 3 convs)
#   x tile: f32 (TM, K) -> cast bf16 in-kernel; w: bf16 (K, N); b: f32 (1, N)
# ----------------------------------------------------------------------------
def _matmul_bias_kernel(x_ref, w_ref, b_ref, o_ref, *, apply_relu):
    acc = jnp.dot(x_ref[...].astype(jnp.bfloat16), w_ref[...],
                  preferred_element_type=jnp.float32)
    acc = acc + b_ref[...]                      # (1, N) broadcasts over rows
    if apply_relu:
        acc = jnp.maximum(acc, 0.0)
    o_ref[...] = acc.astype(o_ref.dtype)


def matmul_bias_act(x, w_bf16, b, *, relu):
    """x: (M, K) f32, w: (K, N) bf16, b: (N,) f32 -> (M, N) f32."""
    M, K = x.shape
    N = w_bf16.shape[1]
    tm = _pick_tm(M)
    return pl.pallas_call(
        functools.partial(_matmul_bias_kernel, apply_relu=relu),
        out_shape=jax.ShapeDtypeStruct((M, N), jnp.float32),
        grid=(pl.cdiv(M, tm),),
        in_specs=[
            pl.BlockSpec((tm, K), lambda i: (i, 0)),
            pl.BlockSpec((K, N), lambda i: (0, 0)),   # weight resident (const idx)
            pl.BlockSpec((1, N), lambda i: (0, 0)),
        ],
        out_specs=pl.BlockSpec((tm, N), lambda i: (i, 0)),
        compiler_params=pltpu.CompilerParams(
            dimension_semantics=("parallel",)),
    )(x, w_bf16, b.reshape(1, N))


# ----------------------------------------------------------------------------
# Pallas kernel 2: fused FC head  out = relu(x @ w1 + b1) @ w2 + b2
#   (the (TM, HIDDEN) intermediate lives in VMEM, never hits HBM)
# ----------------------------------------------------------------------------
def _fc_head_kernel(x_ref, w1_ref, b1_ref, w2_ref, b2_ref, o_ref):
    h = jnp.dot(x_ref[...].astype(jnp.bfloat16), w1_ref[...],
                preferred_element_type=jnp.float32)
    h = jnp.maximum(h + b1_ref[...], 0.0)
    o = jnp.dot(h.astype(jnp.bfloat16), w2_ref[...],
                preferred_element_type=jnp.float32)
    o_ref[...] = (o + b2_ref[...]).astype(o_ref.dtype)


def fc_head(x, w1_bf16, b1, w2_bf16, b2):
    """x: (M, K) f32, w1: (K, H) bf16, w2: (H, A) bf16 -> (M, A) f32."""
    M, K = x.shape
    H = w1_bf16.shape[1]
    A = w2_bf16.shape[1]
    tm = _pick_tm(M)
    # NOTE: for very large conv_out / fc1 weights one would additionally tile
    # K (f32 accumulator scratch, reduction axis "arbitrary") to cap weight
    # residency on v7x's 64 MiB VMEM; at DQN sizes the whole weight fits.
    return pl.pallas_call(
        _fc_head_kernel,
        out_shape=jax.ShapeDtypeStruct((M, A), jnp.float32),
        grid=(pl.cdiv(M, tm),),
        in_specs=[
            pl.BlockSpec((tm, K), lambda i: (i, 0)),
            pl.BlockSpec((K, H), lambda i: (0, 0)),
            pl.BlockSpec((1, H), lambda i: (0, 0)),
            pl.BlockSpec((H, A), lambda i: (0, 0)),
            pl.BlockSpec((1, A), lambda i: (0, 0)),
        ],
        out_specs=pl.BlockSpec((tm, A), lambda i: (i, 0)),
        compiler_params=pltpu.CompilerParams(
            dimension_semantics=("parallel",)),
    )(x, w1_bf16, b1.reshape(1, H), w2_bf16, b2.reshape(1, A))


# ----------------------------------------------------------------------------
# Conv2d (VALID, NHWC activations) via single patches op + Pallas matmul+ReLU.
# conv_general_dilated_patches emits features in (C, kh, kw) order, matching
# torch's weight.reshape(O, C*kh*kw) flattening exactly.
# ----------------------------------------------------------------------------
def conv2d_relu(x_nhwc, w_mat_bf16, b, *, kh, kw, stride):
    B = x_nhwc.shape[0]
    patches = jax.lax.conv_general_dilated_patches(
        x_nhwc, filter_shape=(kh, kw), window_strides=(stride, stride),
        padding="VALID", dimension_numbers=("NHWC", "HWIO", "NHWC"))
    _, Ho, Wo, K = patches.shape
    cols = patches.reshape(B * Ho * Wo, K)
    out = matmul_bias_act(cols, w_mat_bf16, b, relu=True)   # (B*Ho*Wo, O)
    return out.reshape(B, Ho, Wo, -1)                       # channels-last


# ----------------------------------------------------------------------------
# DQN parameters (torch-layout, f32) + Pallas-ready preparation
# ----------------------------------------------------------------------------
def _conv_out_hw(H, W):
    h1, w1 = (H - 8) // 4 + 1, (W - 8) // 4 + 1
    h2, w2 = (h1 - 4) // 2 + 1, (w1 - 4) // 2 + 1
    h3, w3 = (h2 - 3) // 1 + 1, (w2 - 3) // 1 + 1
    return h3, w3


def init_dqn_params(key, input_shape, num_actions):
    C, H, W = input_shape

    def lin_init(k, fan_in, shape):
        bound = 1.0 / jnp.sqrt(fan_in)
        return jax.random.uniform(k, shape, jnp.float32, -bound, bound)

    keys = jax.random.split(key, 10)
    p = {}
    p["c1_w"] = lin_init(keys[0], C * 8 * 8, (32, C, 8, 8))
    p["c1_b"] = lin_init(keys[1], C * 8 * 8, (32,))
    p["c2_w"] = lin_init(keys[2], 32 * 4 * 4, (64, 32, 4, 4))
    p["c2_b"] = lin_init(keys[3], 32 * 4 * 4, (64,))
    p["c3_w"] = lin_init(keys[4], 64 * 3 * 3, (64, 64, 3, 3))
    p["c3_b"] = lin_init(keys[5], 64 * 3 * 3, (64,))

    h3, w3 = _conv_out_hw(H, W)
    conv_out = 64 * h3 * w3

    p["fc1_w"] = lin_init(keys[6], conv_out, (conv_out, HIDDEN_LAYER_SIZE))
    p["fc1_b"] = lin_init(keys[7], conv_out, (HIDDEN_LAYER_SIZE,))
    p["fc2_w"] = lin_init(keys[8], HIDDEN_LAYER_SIZE,
                          (HIDDEN_LAYER_SIZE, num_actions))
    p["fc2_b"] = lin_init(keys[9], HIDDEN_LAYER_SIZE, (num_actions,))
    return p


def prepare_pallas_params(params, input_shape):
    """One-time host-side prep: flatten conv weights to (K, O) bf16, permute
    fc1 rows so the channels-last flatten matches torch's NCHW flatten."""
    _, H, W = input_shape
    h3, w3 = _conv_out_hw(H, W)
    hw = h3 * w3
    O3 = params["c3_w"].shape[0]                      # 64

    pp = {
        "c1_w": params["c1_w"].reshape(params["c1_w"].shape[0], -1).T
                .astype(jnp.bfloat16),
        "c1_b": params["c1_b"],
        "c2_w": params["c2_w"].reshape(params["c2_w"].shape[0], -1).T
                .astype(jnp.bfloat16),
        "c2_b": params["c2_b"],
        "c3_w": params["c3_w"].reshape(params["c3_w"].shape[0], -1).T
                .astype(jnp.bfloat16),
        "c3_b": params["c3_b"],
    }
    # channels-last flat row r = p*O3 + c  must read torch row  c*hw + p
    perm = (jnp.arange(O3)[None, :] * hw + jnp.arange(hw)[:, None]).reshape(-1)
    pp["fc1_w"] = params["fc1_w"][perm, :].astype(jnp.bfloat16)
    pp["fc1_b"] = params["fc1_b"]
    pp["fc2_w"] = params["fc2_w"].astype(jnp.bfloat16)
    pp["fc2_b"] = params["fc2_b"]
    return pp


def dqn_forward(pp, x):
    """x: (B, C, H, W) f32 (torch NCHW input semantics) -> (B, A) f32."""
    h = jnp.transpose(x, (0, 2, 3, 1))            # single NCHW->NHWC at entry
    h = conv2d_relu(h, pp["c1_w"], pp["c1_b"], kh=8, kw=8, stride=4)
    h = conv2d_relu(h, pp["c2_w"], pp["c2_b"], kh=4, kw=4, stride=2)
    h = conv2d_relu(h, pp["c3_w"], pp["c3_b"], kh=3, kw=3, stride=1)
    flat = h.reshape(x.shape[0], -1)              # channels-last flatten
    return fc_head(flat, pp["fc1_w"], pp["fc1_b"], pp["fc2_w"], pp["fc2_b"])


# ----------------------------------------------------------------------------
# Pure-JAX f32 reference (torch semantics) for the correctness check
# ----------------------------------------------------------------------------
def dqn_reference(params, x):
    def conv(x, w, b, s):
        y = jax.lax.conv_general_dilated(
            x, w, window_strides=(s, s), padding="VALID",
            dimension_numbers=("NCHW", "OIHW", "NCHW"))
        return jnp.maximum(y + b[None, :, None, None], 0.0)

    h = conv(x, params["c1_w"], params["c1_b"], 4)
    h = conv(h, params["c2_w"], params["c2_b"], 2)
    h = conv(h, params["c3_w"], params["c3_b"], 1)
    flat = h.reshape(x.shape[0], -1)
    fc1 = jnp.maximum(flat @ params["fc1_w"] + params["fc1_b"], 0.0)
    return fc1 @ params["fc2_w"] + params["fc2_b"]


if __name__ == "__main__":
    # Small-but-valid shapes for the 8/4 -> 4/2 -> 3/1 conv stack:
    # 36x36 -> 8x8 -> 3x3 -> 1x1   (conv_out_size = 64)
    batch, channels, spatial = 2, 4, 36
    num_actions = 6
    input_shape = (channels, spatial, spatial)

    key = jax.random.PRNGKey(0)
    k_param, k_x = jax.random.split(key)
    params = init_dqn_params(k_param, input_shape, num_actions)
    pparams = prepare_pallas_params(params, input_shape)
    x = jax.random.normal(k_x, (batch, channels, spatial, spatial),
                          dtype=jnp.float32)

    forward = jax.jit(dqn_forward)
    out = jax.block_until_ready(forward(pparams, x))
    ref = jax.block_until_ready(dqn_reference(params, x))

    assert out.shape == (batch, num_actions), out.shape
    # bf16 MXU inputs with f32 accumulation -> slightly looser tolerance than
    # a pure-f32 pipeline; expected error is ~1e-3, margin >10x.
    assert jnp.allclose(out, ref, atol=1e-2, rtol=1e-2), (
        "Pallas DQN output mismatch vs JAX reference: "
        f"max abs diff = {jnp.max(jnp.abs(out - ref))}")
    print("KERNEL_OK")
</pallas_src>

<mosaic_0001>
module attributes {stable_mosaic.version = 11 : i64} {
  func.func @_matmul_bias_kernel(%arg0: i32, %arg1: memref<128x256xf32, #tpu.memory_space<vmem>>, %arg2: memref<256x32xbf16, #tpu.memory_space<vmem>>, %arg3: memref<1x32xf32, #tpu.memory_space<vmem>>, %arg4: memref<128x32xf32, #tpu.memory_space<vmem>>) attributes {dimension_semantics = [#tpu.dimension_semantics<parallel>], iteration_bounds = array<i64: 1>, scalar_prefetch = 0 : i64, scratch_operands = 0 : i64, tpu.core_type = #tpu.core_type<tc>, window_params = [{transform_indices = @transform_0, window_bounds = array<i64: 128, 256>}, {pipeline_mode = #tpu.pipeline_mode<synchronous>, transform_indices = @transform_1, window_bounds = array<i64: 256, 32>}, {pipeline_mode = #tpu.pipeline_mode<synchronous>, transform_indices = @transform_2, window_bounds = array<i64: 1, 32>}, {transform_indices = @transform_3, window_bounds = array<i64: 128, 32>}]} {
    %c0 = arith.constant 0 : index
    %c0_0 = arith.constant 0 : index
    %0 = vector.load %arg1[%c0, %c0_0] : memref<128x256xf32, #tpu.memory_space<vmem>>, vector<128x256xf32>
    %1 = arith.truncf %0 : vector<128x256xf32> to vector<128x256xbf16>
    %c0_1 = arith.constant 0 : index
    %c0_2 = arith.constant 0 : index
    %2 = vector.load %arg2[%c0_1, %c0_2] : memref<256x32xbf16, #tpu.memory_space<vmem>>, vector<256x32xbf16>
    %cst = arith.constant dense<0.000000e+00> : vector<128x32xf32>
    %3 = tpu.matmul %1, %2, %cst {dimension_numbers = #tpu.dot_dimension_numbers<[1], [0], [0], [1], [0, 0, 1, 1], [], []>} : vector<128x256xbf16>, vector<256x32xbf16>, vector<128x32xf32> -> vector<128x32xf32>
    %c0_3 = arith.constant 0 : index
    %c0_4 = arith.constant 0 : index
    %4 = vector.load %arg3[%c0_3, %c0_4] : memref<1x32xf32, #tpu.memory_space<vmem>>, vector<1x32xf32>
    %5 = vector.broadcast %4 : vector<1x32xf32> to vector<128x32xf32>
    %6 = arith.addf %3, %5 : vector<128x32xf32>
    %cst_5 = arith.constant 0.000000e+00 : f32
    %7 = vector.broadcast %cst_5 : f32 to vector<128x32xf32>
    %8 = arith.maximumf %6, %7 : vector<128x32xf32>
    %c0_6 = arith.constant 0 : index
    %c0_7 = arith.constant 0 : index
    %9 = vector.load %arg4[%c0_6, %c0_7] : memref<128x32xf32, #tpu.memory_space<vmem>>, vector<128x32xf32>
    tpu.vector_store %arg4[%c0_6, %c0_7], %8 {strides = array<i32>} : memref<128x32xf32, #tpu.memory_space<vmem>>, vector<128x32xf32>,
    return
  }
  func.func @transform_0(%arg0: i32) -> (i32, i32) {
    %c0_i32 = arith.constant 0 : i32
    %c0_i32_0 = arith.constant 0 : i32
    return %arg0, %c0_i32 : i32, i32
  }
  func.func @transform_1(%arg0: i32) -> (i32, i32) {
    %c0_i32 = arith.constant 0 : i32
    %c0_i32_0 = arith.constant 0 : i32
    %c0_i32_1 = arith.constant 0 : i32
    return %c0_i32, %c0_i32_0 : i32, i32
  }
  func.func @transform_2(%arg0: i32) -> (i32, i32) {
    %c0_i32 = arith.constant 0 : i32
    %c0_i32_0 = arith.constant 0 : i32
    %c0_i32_1 = arith.constant 0 : i32
    return %c0_i32, %c0_i32_0 : i32, i32
  }
  func.func @transform_3(%arg0: i32) -> (i32, i32) {
    %c0_i32 = arith.constant 0 : i32
    %c0_i32_0 = arith.constant 0 : i32
    return %arg0, %c0_i32 : i32, i32
  }
}

module attributes {stable_mosaic.version = 11 : i64} {
  func.func @_matmul_bias_kernel(%arg0: i32, %arg1: memref<24x512xf32, #tpu.memory_space<vmem>>, %arg2: memref<512x64xbf16, #tpu.memory_space<vmem>>, %arg3: memref<1x64xf32, #tpu.memory_space<vmem>>, %arg4: memref<24x64xf32, #tpu.memory_space<vmem>>) attributes {dimension_semantics = [#tpu.dimension_semantics<parallel>], iteration_bounds = array<i64: 1>, scalar_prefetch = 0 : i64, scratch_operands = 0 : i64, tpu.core_type = #tpu.core_type<tc>, window_params = [{transform_indices = @transform_0, window_bounds = array<i64: 24, 512>}, {pipeline_mode = #tpu.pipeline_mode<synchronous>, transform_indices = @transform_1, window_bounds = array<i64: 512, 64>}, {pipeline_mode = #tpu.pipeline_mode<synchronous>, transform_indices = @transform_2, window_bounds = array<i64: 1, 64>}, {transform_indices = @transform_3, window_bounds = array<i64: 24, 64>}]} {
    %c0 = arith.constant 0 : index
    %c0_0 = arith.constant 0 : index
    %0 = vector.load %arg1[%c0, %c0_0] : memref<24x512xf32, #tpu.memory_space<vmem>>, vector<24x512xf32>
    %1 = arith.truncf %0 : vector<24x512xf32> to vector<24x512xbf16>
    %c0_1 = arith.constant 0 : index
    %c0_2 = arith.constant 0 : index
    %2 = vector.load %arg2[%c0_1, %c0_2] : memref<512x64xbf16, #tpu.memory_space<vmem>>, vector<512x64xbf16>
    %cst = arith.constant dense<0.000000e+00> : vector<24x64xf32>
    %3 = tpu.matmul %1, %2, %cst {dimension_numbers = #tpu.dot_dimension_numbers<[1], [0], [0], [1], [0, 0, 1, 1], [], []>} : vector<24x512xbf16>, vector<512x64xbf16>, vector<24x64xf32> -> vector<24x64xf32>
    %c0_3 = arith.constant 0 : index
    %c0_4 = arith.constant 0 : index
    %4 = vector.load %arg3[%c0_3, %c0_4] : memref<1x64xf32, #tpu.memory_space<vmem>>, vector<1x64xf32>
    %5 = vector.broadcast %4 : vector<1x64xf32> to vector<24x64xf32>
    %6 = arith.addf %3, %5 : vector<24x64xf32>
    %cst_5 = arith.constant 0.000000e+00 : f32
    %7 = vector.broadcast %cst_5 : f32 to vector<24x64xf32>
    %8 = arith.maximumf %6, %7 : vector<24x64xf32>
    %c0_6 = arith.constant 0 : index
    %c0_7 = arith.constant 0 : index
    %9 = vector.load %arg4[%c0_6, %c0_7] : memref<24x64xf32, #tpu.memory_space<vmem>>, vector<24x64xf32>
    tpu.vector_store %arg4[%c0_6, %c0_7], %8 {strides = array<i32>} : memref<24x64xf32, #tpu.memory_space<vmem>>, vector<24x64xf32>,
    return
  }
  func.func @transform_0(%arg0: i32) -> (i32, i32) {
    %c0_i32 = arith.constant 0 : i32
    %c0_i32_0 = arith.constant 0 : i32
    return %arg0, %c0_i32 : i32, i32
  }
  func.func @transform_1(%arg0: i32) -> (i32, i32) {
    %c0_i32 = arith.constant 0 : i32
    %c0_i32_0 = arith.constant 0 : i32
    %c0_i32_1 = arith.constant 0 : i32
    return %c0_i32, %c0_i32_0 : i32, i32
  }
  func.func @transform_2(%arg0: i32) -> (i32, i32) {
    %c0_i32 = arith.constant 0 : i32
    %c0_i32_0 = arith.constant 0 : i32
    %c0_i32_1 = arith.constant 0 : i32
    return %c0_i32, %c0_i32_0 : i32, i32
  }
  func.func @transform_3(%arg0: i32) -> (i32, i32) {
    %c0_i32 = arith.constant 0 : i32
    %c0_i32_0 = arith.constant 0 : i32
    return %arg0, %c0_i32 : i32, i32
  }
}

module attributes {stable_mosaic.version = 11 : i64} {
  func.func @_matmul_bias_kernel(%arg0: i32, %arg1: memref<8x576xf32, #tpu.memory_space<vmem>>, %arg2: memref<576x64xbf16, #tpu.memory_space<vmem>>, %arg3: memref<1x64xf32, #tpu.memory_space<vmem>>, %arg4: memref<8x64xf32, #tpu.memory_space<vmem>>) attributes {dimension_semantics = [#tpu.dimension_semantics<parallel>], iteration_bounds = array<i64: 1>, scalar_prefetch = 0 : i64, scratch_operands = 0 : i64, tpu.core_type = #tpu.core_type<tc>, window_params = [{transform_indices = @transform_0, window_bounds = array<i64: 8, 576>}, {pipeline_mode = #tpu.pipeline_mode<synchronous>, transform_indices = @transform_1, window_bounds = array<i64: 576, 64>}, {pipeline_mode = #tpu.pipeline_mode<synchronous>, transform_indices = @transform_2, window_bounds = array<i64: 1, 64>}, {transform_indices = @transform_3, window_bounds = array<i64: 8, 64>}]} {
    %c0 = arith.constant 0 : index
    %c0_0 = arith.constant 0 : index
    %0 = vector.load %arg1[%c0, %c0_0] : memref<8x576xf32, #tpu.memory_space<vmem>>, vector<8x576xf32>
    %1 = arith.truncf %0 : vector<8x576xf32> to vector<8x576xbf16>
    %c0_1 = arith.constant 0 : index
    %c0_2 = arith.constant 0 : index
    %2 = vector.load %arg2[%c0_1, %c0_2] : memref<576x64xbf16, #tpu.memory_space<vmem>>, vector<576x64xbf16>
    %cst = arith.constant dense<0.000000e+00> : vector<8x64xf32>
    %3 = tpu.matmul %1, %2, %cst {dimension_numbers = #tpu.dot_dimension_numbers<[1], [0], [0], [1], [0, 0, 1, 1], [], []>} : vector<8x576xbf16>, vector<576x64xbf16>, vector<8x64xf32> -> vector<8x64xf32>
    %c0_3 = arith.constant 0 : index
    %c0_4 = arith.constant 0 : index
    %4 = vector.load %arg3[%c0_3, %c0_4] : memref<1x64xf32, #tpu.memory_space<vmem>>, vector<1x64xf32>
    %5 = vector.broadcast %4 : vector<1x64xf32> to vector<8x64xf32>
    %6 = arith.addf %3, %5 : vector<8x64xf32>
    %cst_5 = arith.constant 0.000000e+00 : f32
    %7 = vector.broadcast %cst_5 : f32 to vector<8x64xf32>
    %8 = arith.maximumf %6, %7 : vector<8x64xf32>
    %c0_6 = arith.constant 0 : index
    %c0_7 = arith.constant 0 : index
    %9 = vector.load %arg4[%c0_6, %c0_7] : memref<8x64xf32, #tpu.memory_space<vmem>>, vector<8x64xf32>
    tpu.vector_store %arg4[%c0_6, %c0_7], %8 {strides = array<i32>} : memref<8x64xf32, #tpu.memory_space<vmem>>, vector<8x64xf32>,
    return
  }
  func.func @transform_0(%arg0: i32) -> (i32, i32) {
    %c0_i32 = arith.constant 0 : i32
    %c0_i32_0 = arith.constant 0 : i32
    return %arg0, %c0_i32 : i32, i32
  }
  func.func @transform_1(%arg0: i32) -> (i32, i32) {
    %c0_i32 = arith.constant 0 : i32
    %c0_i32_0 = arith.constant 0 : i32
    %c0_i32_1 = arith.constant 0 : i32
    return %c0_i32, %c0_i32_0 : i32, i32
  }
  func.func @transform_2(%arg0: i32) -> (i32, i32) {
    %c0_i32 = arith.constant 0 : i32
    %c0_i32_0 = arith.constant 0 : i32
    %c0_i32_1 = arith.constant 0 : i32
    return %c0_i32, %c0_i32_0 : i32, i32
  }
  func.func @transform_3(%arg0: i32) -> (i32, i32) {
    %c0_i32 = arith.constant 0 : i32
    %c0_i32_0 = arith.constant 0 : i32
    return %arg0, %c0_i32 : i32, i32
  }
}

module attributes {stable_mosaic.version = 11 : i64} {
  func.func @_fc_head_kernel(%arg0: i32, %arg1: memref<8x64xf32, #tpu.memory_space<vmem>>, %arg2: memref<64x1024xbf16, #tpu.memory_space<vmem>>, %arg3: memref<1x1024xf32, #tpu.memory_space<vmem>>, %arg4: memref<1024x6xbf16, #tpu.memory_space<vmem>>, %arg5: memref<1x6xf32, #tpu.memory_space<vmem>>, %arg6: memref<8x6xf32, #tpu.memory_space<vmem>>) attributes {dimension_semantics = [#tpu.dimension_semantics<parallel>], iteration_bounds = array<i64: 1>, scalar_prefetch = 0 : i64, scratch_operands = 0 : i64, tpu.core_type = #tpu.core_type<tc>, window_params = [{transform_indices = @transform_0, window_bounds = array<i64: 8, 64>}, {pipeline_mode = #tpu.pipeline_mode<synchronous>, transform_indices = @transform_1, window_bounds = array<i64: 64, 1024>}, {pipeline_mode = #tpu.pipeline_mode<synchronous>, transform_indices = @transform_2, window_bounds = array<i64: 1, 1024>}, {pipeline_mode = #tpu.pipeline_mode<synchronous>, transform_indices = @transform_3, window_bounds = array<i64: 1024, 6>}, {pipeline_mode = #tpu.pipeline_mode<synchronous>, transform_indices = @transform_4, window_bounds = array<i64: 1, 6>}, {transform_indices = @transform_5, window_bounds = array<i64: 8, 6>}]} {
    %c0 = arith.constant 0 : index
    %c0_0 = arith.constant 0 : index
    %0 = vector.load %arg1[%c0, %c0_0] : memref<8x64xf32, #tpu.memory_space<vmem>>, vector<8x64xf32>
    %1 = arith.truncf %0 : vector<8x64xf32> to vector<8x64xbf16>
    %c0_1 = arith.constant 0 : index
    %c0_2 = arith.constant 0 : index
    %2 = vector.load %arg2[%c0_1, %c0_2] : memref<64x1024xbf16, #tpu.memory_space<vmem>>, vector<64x1024xbf16>
    %cst = arith.constant dense<0.000000e+00> : vector<8x1024xf32>
    %3 = tpu.matmul %1, %2, %cst {dimension_numbers = #tpu.dot_dimension_numbers<[1], [0], [0], [1], [0, 0, 1, 1], [], []>} : vector<8x64xbf16>, vector<64x1024xbf16>, vector<8x1024xf32> -> vector<8x1024xf32>
    %c0_3 = arith.constant 0 : index
    %c0_4 = arith.constant 0 : index
    %4 = vector.load %arg3[%c0_3, %c0_4] : memref<1x1024xf32, #tpu.memory_space<vmem>>, vector<1x1024xf32>
    %5 = vector.broadcast %4 : vector<1x1024xf32> to vector<8x1024xf32>
    %6 = arith.addf %3, %5 : vector<8x1024xf32>
    %cst_5 = arith.constant 0.000000e+00 : f32
    %7 = vector.broadcast %cst_5 : f32 to vector<8x1024xf32>
    %8 = arith.maximumf %6, %7 : vector<8x1024xf32>
    %9 = arith.truncf %8 : vector<8x1024xf32> to vector<8x1024xbf16>
    %c0_6 = arith.constant 0 : index
    %c0_7 = arith.constant 0 : index
    %10 = vector.load %arg4[%c0_6, %c0_7] : memref<1024x6xbf16, #tpu.memory_space<vmem>>, vector<1024x6xbf16>
    %cst_8 = arith.constant dense<0.000000e+00> : vector<8x6xf32>
    %11 = tpu.matmul %9, %10, %cst_8 {dimension_numbers = #tpu.dot_dimension_numbers<[1], [0], [0], [1], [0, 0, 1, 1], [], []>} : vector<8x1024xbf16>, vector<1024x6xbf16>, vector<8x6xf32> -> vector<8x6xf32>
    %c0_9 = arith.constant 0 : index
    %c0_10 = arith.constant 0 : index
    %12 = vector.load %arg5[%c0_9, %c0_10] : memref<1x6xf32, #tpu.memory_space<vmem>>, vector<1x6xf32>
    %13 = vector.broadcast %12 : vector<1x6xf32> to vector<8x6xf32>
    %14 = arith.addf %11, %13 : vector<8x6xf32>
    %c0_11 = arith.constant 0 : index
    %c0_12 = arith.constant 0 : index
    %15 = vector.load %arg6[%c0_11, %c0_12] : memref<8x6xf32, #tpu.memory_space<vmem>>, vector<8x6xf32>
    tpu.vector_store %arg6[%c0_11, %c0_12], %14 {strides = array<i32>} : memref<8x6xf32, #tpu.memory_space<vmem>>, vector<8x6xf32>,
    return
  }
  func.func @transform_0(%arg0: i32) -> (i32, i32) {
    %c0_i32 = arith.constant 0 : i32
    %c0_i32_0 = arith.constant 0 : i32
    return %arg0, %c0_i32 : i32, i32
  }
  func.func @transform_1(%arg0: i32) -> (i32, i32) {
    %c0_i32 = arith.constant 0 : i32
    %c0_i32_0 = arith.constant 0 : i32
    %c0_i32_1 = arith.constant 0 : i32
    return %c0_i32, %c0_i32_0 : i32, i32
  }
  func.func @transform_2(%arg0: i32) -> (i32, i32) {
    %c0_i32 = arith.constant 0 : i32
    %c0_i32_0 = arith.constant 0 : i32
    %c0_i32_1 = arith.constant 0 : i32
    return %c0_i32, %c0_i32_0 : i32, i32
  }
  func.func @transform_3(%arg0: i32) -> (i32, i32) {
    %c0_i32 = arith.constant 0 : i32
    %c0_i32_0 = arith.constant 0 : i32
    %c0_i32_1 = arith.constant 0 : i32
    return %c0_i32, %c0_i32_0 : i32, i32
  }
  func.func @transform_4(%arg0: i32) -> (i32, i32) {
    %c0_i32 = arith.constant 0 : i32
    %c0_i32_0 = arith.constant 0 : i32
    %c0_i32_1 = arith.constant 0 : i32
    return %c0_i32, %c0_i32_0 : i32, i32
  }
  func.func @transform_5(%arg0: i32) -> (i32, i32) {
    %c0_i32 = arith.constant 0 : i32
    %c0_i32_0 = arith.constant 0 : i32
    return %arg0, %c0_i32 : i32, i32
  }
}

</mosaic_0001>

<bundles_post_ra>
// kernel: dqn_forward.4
= control target key start
LH: loop header
LB: loop body
LE: loop exit
PB: predicated region body
PF: predicated region fallthrough
CT: control target
= control target key end

     0   :  { %vm308_vm0 = vcmask 261120   ;;  %s675_s1 = inlined_call_operand.vmem [shape: bf16[256,32], index: 1, kind: input, shape index: {}]   ;;  %s676_s2 = inlined_call_operand.vmem [shape: f32[1,32], index: 2, kind: input, shape index: {}]   ;;  %s677_s0 = inlined_call_operand.vmem [shape: f32[128,256], index: 0, kind: input, shape index: {}]   ;;  %s678_s3 = inlined_call_operand.vmem [shape: f32[128,32], index: 3, kind: output, shape index: {}]  }
   0x1   :  { %v400_v0 = vld [vmem:[%s675_s1 + $0x38] sm:$0xff]  ;;  %v399_v2 = vld [vmem:[%s675_s1 + $0x30] sm:$0xff]  ;;  %v398_v4 = vld [vmem:[%s675_s1 + $0x28] sm:$0xff] }
   0x2   :  { %v408_v1 = vld [vmem:[%s675_s1 + $0x78] sm:$0xff]  ;;  %194 = vmatpush.bf16.msra.mxu0 %v400_v0  ;;  %409 = vmatpush.bf16.msra.mxu2 %v400_v0  ;;  %v407_v3 = vld [vmem:[%s675_s1 + $0x70] sm:$0xff]  ;;  %v406_v5 = vld [vmem:[%s675_s1 + $0x68] sm:$0xff] }
   0x3   :  { %243 = vmatpush.bf16.msra.mxu1 %v408_v1  ;;  %417 = vmatpush.bf16.msra.mxu3 %v408_v1  ;;  %v397_v6 = vld [vmem:[%s675_s1 + $0x20] sm:$0xff]  ;;  %v396_v8 = vld [vmem:[%s675_s1 + $0x18] sm:$0xff]  ;;  %v395_v10 = vld [vmem:[%s675_s1 + $0x10] sm:$0xff] }
   0x4   :  { %v405_v7 = vld [vmem:[%s675_s1 + $0x60] sm:$0xff]  ;;  %v404_v9 = vld [vmem:[%s675_s1 + $0x58] sm:$0xff]  ;;  %v403_v11 = vld [vmem:[%s675_s1 + $0x50] sm:$0xff] }
   0x5   :  { %v394_v12 = vld [vmem:[%s675_s1 + $0x8] sm:$0xff]  ;;  %v393_v14 = vld [vmem:[%s675_s1] sm:$0xff]  ;;  %v16_v17 = vld [vmem:[%s677_s0 + $0x10] sm:$0xff] }
   0x6   :  { %195 = vmatpush.bf16.msra.mxu0 %v399_v2  ;;  %410 = vmatpush.bf16.msra.mxu2 %v399_v2  ;;  %v402_v13 = vld [vmem:[%s675_s1 + $0x48] sm:$0xff]  ;;  %v401_v15 = vld [vmem:[%s675_s1 + $0x40] sm:$0xff]  ;;  %v32_v19 = vld [vmem:[%s677_s0 + $0x90] sm:$0xff] }
   0x7   :  { %244 = vmatpush.bf16.msra.mxu1 %v407_v3  ;;  %418 = vmatpush.bf16.msra.mxu3 %v407_v3  ;;  %v14_v16 = vld [vmem:[%s677_s0] sm:$0xff]  ;;  %v15_v20 = vld [vmem:[%s677_s0 + $0x8] sm:$0xff]  ;;  %v17_v21 = vld [vmem:[%s677_s0 + $0x18] sm:$0xff] }
   0x8   :  { %v30_v18 = vld [vmem:[%s677_s0 + $0x80] sm:$0xff]  ;;  %v31_v22 = vld [vmem:[%s677_s0 + $0x88] sm:$0xff]  ;;  %v33_v23 = vld [vmem:[%s677_s0 + $0x98] sm:$0xff]  ;;  %v46_v24 = vpack.c.bf16 %v16_v17, %v14_v16  ;;  %v47_v26 = vpack.c.bf16 %v17_v21, %v15_v20 }
   0x9   :  { %v54_v25 = vpack.c.bf16 %v32_v19, %v30_v18  ;;  %v55_v27 = vpack.c.bf16 %v33_v23, %v31_v22  ;;  %v18_v28 = vld [vmem:[%s677_s0 + $0x20] sm:$0xff]  ;;  %v20_v29 = vld [vmem:[%s677_s0 + $0x30] sm:$0xff]  ;;  %v19_v32 = vld [vmem:[%s677_s0 + $0x28] sm:$0xff] }
   0xa   :  { %196 = vmatpush.bf16.msra.mxu0 %v398_v4  ;;  %411 = vmatpush.bf16.msra.mxu2 %v398_v4  ;;  %v34_v30 = vld [vmem:[%s677_s0 + $0xa0] sm:$0xff]  ;;  %v36_v31 = vld [vmem:[%s677_s0 + $0xb0] sm:$0xff]  ;;  %v21_v33 = vld [vmem:[%s677_s0 + $0x38] sm:$0xff]  ;;  %v48_v36 = vpack.c.bf16 %v20_v29, %v18_v28 }
   0xb   :  { %245 = vmatpush.bf16.msra.mxu1 %v406_v5  ;;  %419 = vmatpush.bf16.msra.mxu3 %v406_v5  ;;  %v35_v34 = vld [vmem:[%s677_s0 + $0xa8] sm:$0xff]  ;;  %v37_v35 = vld [vmem:[%s677_s0 + $0xb8] sm:$0xff]  ;;  %v56_v37 = vpack.c.bf16 %v36_v31, %v34_v30  ;;  %v49_v38 = vpack.c.bf16 %v21_v33, %v19_v32  ;;  %v22_v40 = vld [vmem:[%s677_s0 + $0x40] sm:$0xff] }
   0xc   :  { %v57_v39 = vpack.c.bf16 %v37_v35, %v35_v34  ;;  %v24_v41 = vld [vmem:[%s677_s0 + $0x50] sm:$0xff]  ;;  %v38_v42 = vld [vmem:[%s677_s0 + $0xc0] sm:$0xff]  ;;  %v23_v44 = vld [vmem:[%s677_s0 + $0x48] sm:$0xff] }
   0xd   :  { %v40_v43 = vld [vmem:[%s677_s0 + $0xd0] sm:$0xff]  ;;  %v25_v45 = vld [vmem:[%s677_s0 + $0x58] sm:$0xff]  ;;  %v39_v46 = vld [vmem:[%s677_s0 + $0xc8] sm:$0xff]  ;;  %v50_v48 = vpack.c.bf16 %v24_v41, %v22_v40 }
   0xe   :  { %197 = vmatpush.bf16.msra.mxu0 %v397_v6  ;;  %412 = vmatpush.bf16.msra.mxu2 %v397_v6  ;;  %v41_v47 = vld [vmem:[%s677_s0 + $0xd8] sm:$0xff]  ;;  %v58_v49 = vpack.c.bf16 %v40_v43, %v38_v42  ;;  %v51_v50 = vpack.c.bf16 %v25_v45, %v23_v44  ;;  %v26_v52 = vld [vmem:[%s677_s0 + $0x60] sm:$0xff]  ;;  %v28_v53 = vld [vmem:[%s677_s0 + $0x70] sm:$0xff] }
   0xf   :  { %246 = vmatpush.bf16.msra.mxu1 %v405_v7  ;;  %420 = vmatpush.bf16.msra.mxu3 %v405_v7  ;;  %v59_v51 = vpack.c.bf16 %v41_v47, %v39_v46  ;;  %v42_v54 = vld [vmem:[%s677_s0 + $0xe0] sm:$0xff]  ;;  %v44_v55 = vld [vmem:[%s677_s0 + $0xf0] sm:$0xff]  ;;  %v27_v56 = vld [vmem:[%s677_s0 + $0x68] sm:$0xff]  ;;  %v52_v60 = vpack.c.bf16 %v28_v53, %v26_v52 }
  0x10   :  { %v29_v57 = vld [vmem:[%s677_s0 + $0x78] sm:$0xff]  ;;  %v43_v58 = vld [vmem:[%s677_s0 + $0xe8] sm:$0xff]  ;;  %v60_v61 = vpack.c.bf16 %v44_v55, %v42_v54  ;;  %v593_v0 = vld [vmem:[%s676_s2] ss:$0 sm:$0xff] }
  0x11   :  { %v45_v59 = vld [vmem:[%s677_s0 + $0xf8] sm:$0xff]  ;;  %v53_v62 = vpack.c.bf16 %v29_v57, %v27_v56 }
  0x12   :  { %198 = vmatpush.bf16.msra.mxu0 %v396_v8  ;;  %413 = vmatpush.bf16.msra.mxu2 %v396_v8  ;;  %v61_v63 = vpack.c.bf16 %v45_v59, %v43_v58 }
  0x13   :  { %247 = vmatpush.bf16.msra.mxu1 %v404_v9  ;;  %421 = vmatpush.bf16.msra.mxu3 %v404_v9 }
  0x16   :  { %199 = vmatpush.bf16.msra.mxu0 %v395_v10  ;;  %414 = vmatpush.bf16.msra.mxu2 %v395_v10 }
  0x17   :  { %248 = vmatpush.bf16.msra.mxu1 %v403_v11  ;;  %422 = vmatpush.bf16.msra.mxu3 %v403_v11 }
  0x1a   :  { %200 = vmatpush.bf16.msra.mxu0 %v394_v12  ;;  %415 = vmatpush.bf16.msra.mxu2 %v394_v12 }
  0x1b   :  { %249 = vmatpush.bf16.msra.mxu1 %v402_v13  ;;  %423 = vmatpush.bf16.msra.mxu3 %v402_v13 }
  0x1e   :  { %201 = vmatpush.bf16.msra.mxu0 %v393_v14  ;;  %416 = vmatpush.bf16.msra.mxu2 %v393_v14 }
  0x1f   :  { %250 = vmatpush.bf16.msra.mxu1 %v401_v15  ;;  %424 = vmatpush.bf16.msra.mxu3 %v401_v15 }
  0x21   :  { %202 = vmatmul.bf16.vlgmr.msra.gmra.mxu0 %v46_v24  ;;  %222 = vmatmul.bf16.vlgmr.msra.gmra.mxu2 %v54_v25 }
  0x22   :  { %251 = vmatmul.bf16.vlgmr.msra.gmra.mxu1 %v47_v26  ;;  %271 = vmatmul.bf16.vlgmr.msra.gmra.mxu3 %v55_v27 }
  0x31   :  { %207 = vmatmul.bf16.gmra.mxu0 %v48_v36  ;;  %227 = vmatmul.bf16.gmra.mxu2 %v56_v37 }
  0x32   :  { %256 = vmatmul.bf16.gmra.mxu1 %v49_v38  ;;  %276 = vmatmul.bf16.gmra.mxu3 %v57_v39 }
  0x41   :  { %212 = vmatmul.bf16.gmra.mxu0 %v50_v48  ;;  %232 = vmatmul.bf16.gmra.mxu2 %v58_v49 }
  0x42   :  { %261 = vmatmul.bf16.gmra.mxu1 %v51_v50  ;;  %281 = vmatmul.bf16.gmra.mxu3 %v59_v51 }
  0x51   :  { %217 = vmatmul.bf16.gmra.mxu0 %v52_v60  ;;  %237 = vmatmul.bf16.gmra.mxu2 %v60_v61 }
  0x52   :  { %266 = vmatmul.bf16.gmra.mxu1 %v53_v62  ;;  %286 = vmatmul.bf16.gmra.mxu3 %v61_v63 }
  0x9e   :  { %v203_v1 = vpop.f32.mrf.mxu0 }
  0x9f   :  { %v204_v2 = vadd.f32 %v593_v0, %v203_v1  ;;  %v252_v3 = vpop.f32.mrf.mxu1 }
  0xa1   :  { %v253_v4 = vadd.f32 %v252_v3, %v204_v2 }
  0xa3   :  { %v292_v5 = vmax.f32 %v253_v4, 0.0 }
  0xa4   :  { %v223_v6 = vpop.f32.mrf.mxu2 }
  0xa5   :  { %309 = vst.msk [vmem:[%s678_s3] sm:$0xff] %vm308_vm0, %v292_v5  ;;  %v224_v7 = vadd.f32 %v593_v0, %v223_v6  ;;  %v272_v8 = vpop.f32.mrf.mxu3 }
  0xa6   :  { %v205_v9 = vpop.f32.mrf.mxu0 }
  0xa7   :  { %v273_v10 = vadd.f32 %v272_v8, %v224_v7  ;;  %v206_v11 = vadd.f32 %v593_v0, %v205_v9  ;;  %v254_v12 = vpop.f32.mrf.mxu1 }
  0xa9   :  { %v300_v13 = vmax.f32 %v273_v10, 0.0  ;;  %v255_v14 = vadd.f32 %v254_v12, %v206_v11 }
  0xab   :  { %317 = vst.msk [vmem:[%s678_s3 + $0x40] sm:$0xff] %vm308_vm0, %v300_v13  ;;  %v293_v15 = vmax.f32 %v255_v14, 0.0 }
  0xac   :  { %v225_v16 = vpop.f32.mrf.mxu2 }
  0xad   :  { %310 = vst.msk [vmem:[%s678_s3 + $0x8] sm:$0xff] %vm308_vm0, %v293_v15  ;;  %v226_v17 = vadd.f32 %v593_v0, %v225_v16  ;;  %v274_v18 = vpop.f32.mrf.mxu3 }
  0xae   :  { %v208_v19 = vpop.f32.mrf.mxu0 }
  0xaf   :  { %v275_v20 = vadd.f32 %v274_v18, %v226_v17  ;;  %v209_v21 = vadd.f32 %v593_v0, %v208_v19  ;;  %v257_v22 = vpop.f32.mrf.mxu1 }
  0xb1   :  { %v301_v23 = vmax.f32 %v275_v20, 0.0  ;;  %v258_v24 = vadd.f32 %v257_v22, %v209_v21 }
  0xb3   :  { %318 = vst.msk [vmem:[%s678_s3 + $0x48] sm:$0xff] %vm308_vm0, %v301_v23  ;;  %v294_v25 = vmax.f32 %v258_v24, 0.0 }
  0xb4   :  { %v228_v26 = vpop.f32.mrf.mxu2 }
  0xb5   :  { %311 = vst.msk [vmem:[%s678_s3 + $0x10] sm:$0xff] %vm308_vm0, %v294_v25  ;;  %v229_v27 = vadd.f32 %v593_v0, %v228_v26  ;;  %v277_v28 = vpop.f32.mrf.mxu3 }
  0xb6   :  { %v210_v29 = vpop.f32.mrf.mxu0 }
  0xb7   :  { %v278_v30 = vadd.f32 %v277_v28, %v229_v27  ;;  %v211_v31 = vadd.f32 %v593_v0, %v210_v29  ;;  %v259_v32 = vpop.f32.mrf.mxu1 }
  0xb9   :  { %v302_v33 = vmax.f32 %v278_v30, 0.0  ;;  %v260_v34 = vadd.f32 %v259_v32, %v211_v31 }
  0xbb   :  { %319 = vst.msk [vmem:[%s678_s3 + $0x50] sm:$0xff] %vm308_vm0, %v302_v33  ;;  %v295_v35 = vmax.f32 %v260_v34, 0.0 }
  0xbc   :  { %v230_v36 = vpop.f32.mrf.mxu2 }
  0xbd   :  { %312 = vst.msk [vmem:[%s678_s3 + $0x18] sm:$0xff] %vm308_vm0, %v295_v35  ;;  %v231_v37 = vadd.f32 %v593_v0, %v230_v36  ;;  %v279_v38 = vpop.f32.mrf.mxu3 }
  0xbe   :  { %v213_v39 = vpop.f32.mrf.mxu0 }
  0xbf   :  { %v280_v40 = vadd.f32 %v279_v38, %v231_v37  ;;  %v214_v41 = vadd.f32 %v593_v0, %v213_v39  ;;  %v262_v42 = vpop.f32.mrf.mxu1 }
  0xc1   :  { %v303_v43 = vmax.f32 %v280_v40, 0.0  ;;  %v263_v44 = vadd.f32 %v262_v42, %v214_v41 }
  0xc3   :  { %320 = vst.msk [vmem:[%s678_s3 + $0x58] sm:$0xff] %vm308_vm0, %v303_v43  ;;  %v296_v45 = vmax.f32 %v263_v44, 0.0 }
  0xc4   :  { %v233_v46 = vpop.f32.mrf.mxu2 }
  0xc5   :  { %313 = vst.msk [vmem:[%s678_s3 + $0x20] sm:$0xff] %vm308_vm0, %v296_v45  ;;  %v234_v47 = vadd.f32 %v593_v0, %v233_v46  ;;  %v282_v48 = vpop.f32.mrf.mxu3 }
  0xc6   :  { %v215_v49 = vpop.f32.mrf.mxu0 }
  0xc7   :  { %v283_v50 = vadd.f32 %v282_v48, %v234_v47  ;;  %v216_v51 = vadd.f32 %v593_v0, %v215_v49  ;;  %v264_v52 = vpop.f32.mrf.mxu1 }
  0xc9   :  { %v304_v53 = vmax.f32 %v283_v50, 0.0  ;;  %v265_v54 = vadd.f32 %v264_v52, %v216_v51 }
  0xcb   :  { %321 = vst.msk [vmem:[%s678_s3 + $0x60] sm:$0xff] %vm308_vm0, %v304_v53  ;;  %v297_v55 = vmax.f32 %v265_v54, 0.0 }
  0xcc   :  { %v235_v56 = vpop.f32.mrf.mxu2 }
  0xcd   :  { %314 = vst.msk [vmem:[%s678_s3 + $0x28] sm:$0xff] %vm308_vm0, %v297_v55  ;;  %v236_v57 = vadd.f32 %v593_v0, %v235_v56  ;;  %v284_v58 = vpop.f32.mrf.mxu3 }
  0xce   :  { %v218_v59 = vpop.f32.mrf.mxu0 }
  0xcf   :  { %v285_v60 = vadd.f32 %v284_v58, %v236_v57  ;;  %v219_v61 = vadd.f32 %v593_v0, %v218_v59  ;;  %v267_v62 = vpop.f32.mrf.mxu1 }
  0xd1   :  { %v305_v63 = vmax.f32 %v285_v60, 0.0  ;;  %v268_v1 = vadd.f32 %v267_v62, %v219_v61 }
  0xd3   :  { %322 = vst.msk [vmem:[%s678_s3 + $0x68] sm:$0xff] %vm308_vm0, %v305_v63  ;;  %v298_v2 = vmax.f32 %v268_v1, 0.0 }
  0xd4   :  { %v238_v3 = vpop.f32.mrf.mxu2 }
  0xd5   :  { %315 = vst.msk [vmem:[%s678_s3 + $0x30] sm:$0xff] %vm308_vm0, %v298_v2  ;;  %v239_v4 = vadd.f32 %v593_v0, %v238_v3  ;;  %v287_v5 = vpop.f32.mrf.mxu3 }
  0xd6   :  { %v220_v6 = vpop.f32.mrf.mxu0 }
  0xd7   :  { %v288_v7 = vadd.f32 %v287_v5, %v239_v4  ;;  %v221_v8 = vadd.f32 %v593_v0, %v220_v6  ;;  %v269_v9 = vpop.f32.mrf.mxu1 }
  0xd9   :  { %v306_v10 = vmax.f32 %v288_v7, 0.0  ;;  %v270_v11 = vadd.f32 %v269_v9, %v221_v8 }
  0xdb   :  { %323 = vst.msk [vmem:[%s678_s3 + $0x70] sm:$0xff] %vm308_vm0, %v306_v10  ;;  %v299_v12 = vmax.f32 %v270_v11, 0.0 }
  0xdc   :  { %v240_v13 = vpop.f32.mrf.mxu2 }
  0xdd   :  { %316 = vst.msk [vmem:[%s678_s3 + $0x38] sm:$0xff] %vm308_vm0, %v299_v12  ;;  %v241_v14 = vadd.f32 %v593_v0, %v240_v13  ;;  %v289_v15 = vpop.f32.mrf.mxu3 }
  0xdf   :  { %v290_v16 = vadd.f32 %v289_v15, %v241_v14 }
  0xe1   :  { %v307_v17 = vmax.f32 %v290_v16, 0.0 }
  0xe3   :  { %324 = vst.msk [vmem:[%s678_s3 + $0x78] sm:$0xff] %vm308_vm0, %v307_v17 }

// kernel: dqn_forward.5
= control target key start
LH: loop header
LB: loop body
LE: loop exit
PB: predicated region body
PF: predicated region fallthrough
CT: control target
= control target key end

     0   :  { %vm369_vm0 = vcmask 523264   ;;  %s705_s1 = inlined_call_operand.vmem [shape: bf16[512,64], index: 1, kind: input, shape index: {}]   ;;  %s706_s2 = inlined_call_operand.vmem [shape: f32[1,64], index: 2, kind: input, shape index: {}]   ;;  %s707_s0 = inlined_call_operand.vmem [shape: f32[18,512], index: 0, kind: input, shape index: {}]   ;;  %s708_s3 = inlined_call_operand.vmem [shape: f32[18,64], index: 3, kind: output, shape index: {}]  }
   0x1   :  { %v512_v0 = vld [vmem:[%s705_s1 + $0x38] sm:$0xff]  ;;  %v511_v4 = vld [vmem:[%s705_s1 + $0x30] sm:$0xff]  ;;  %v510_v8 = vld [vmem:[%s705_s1 + $0x28] sm:$0xff] }
   0x2   :  { %v520_v1 = vld [vmem:[%s705_s1 + $0x78] sm:$0xff]  ;;  %294 = vmatpush.bf16.msra.mxu0 %v512_v0  ;;  %v519_v5 = vld [vmem:[%s705_s1 + $0x70] sm:$0xff]  ;;  %v518_v9 = vld [vmem:[%s705_s1 + $0x68] sm:$0xff] }
   0x3   :  { %v528_v2 = vld [vmem:[%s705_s1 + $0xb8] sm:$0xff]  ;;  %312 = vmatpush.bf16.msra.mxu1 %v520_v1  ;;  %v527_v6 = vld [vmem:[%s705_s1 + $0xb0] sm:$0xff]  ;;  %v526_v10 = vld [vmem:[%s705_s1 + $0xa8] sm:$0xff] }
   0x4   :  { %v536_v3 = vld [vmem:[%s705_s1 + $0xf8] sm:$0xff]  ;;  %330 = vmatpush.bf16.msra.mxu2 %v528_v2  ;;  %v535_v7 = vld [vmem:[%s705_s1 + $0xf0] sm:$0xff]  ;;  %v534_v11 = vld [vmem:[%s705_s1 + $0xe8] sm:$0xff] }
   0x5   :  { %348 = vmatpush.bf16.msra.mxu3 %v536_v3  ;;  %v509_v12 = vld [vmem:[%s705_s1 + $0x20] sm:$0xff]  ;;  %v508_v16 = vld [vmem:[%s705_s1 + $0x18] sm:$0xff]  ;;  %v507_v20 = vld [vmem:[%s705_s1 + $0x10] sm:$0xff] }
   0x6   :  { %295 = vmatpush.bf16.msra.mxu0 %v511_v4  ;;  %v517_v13 = vld [vmem:[%s705_s1 + $0x60] sm:$0xff]  ;;  %v516_v17 = vld [vmem:[%s705_s1 + $0x58] sm:$0xff]  ;;  %v515_v21 = vld [vmem:[%s705_s1 + $0x50] sm:$0xff] }
   0x7   :  { %313 = vmatpush.bf16.msra.mxu1 %v519_v5  ;;  %v525_v14 = vld [vmem:[%s705_s1 + $0xa0] sm:$0xff]  ;;  %v524_v18 = vld [vmem:[%s705_s1 + $0x98] sm:$0xff]  ;;  %v523_v22 = vld [vmem:[%s705_s1 + $0x90] sm:$0xff] }
   0x8   :  { %331 = vmatpush.bf16.msra.mxu2 %v527_v6  ;;  %v533_v15 = vld [vmem:[%s705_s1 + $0xe0] sm:$0xff]  ;;  %v532_v19 = vld [vmem:[%s705_s1 + $0xd8] sm:$0xff]  ;;  %v531_v23 = vld [vmem:[%s705_s1 + $0xd0] sm:$0xff] }
   0x9   :  { %349 = vmatpush.bf16.msra.mxu3 %v535_v7  ;;  %v506_v24 = vld [vmem:[%s705_s1 + $0x8] sm:$0xff]  ;;  %v505_v28 = vld [vmem:[%s705_s1] sm:$0xff]  ;;  %v16_v36 = vld [vmem:[%s707_s0 + $0x10] sm:$0xff] }
   0xa   :  { %296 = vmatpush.bf16.msra.mxu0 %v510_v8  ;;  %v514_v25 = vld [vmem:[%s705_s1 + $0x48] sm:$0xff]  ;;  %v513_v29 = vld [vmem:[%s705_s1 + $0x40] sm:$0xff]  ;;  %v20_v37 = vld [vmem:[%s707_s0 + $0x30] sm:$0xff] }
   0xb   :  { %314 = vmatpush.bf16.msra.mxu1 %v518_v9  ;;  %v522_v26 = vld [vmem:[%s705_s1 + $0x88] sm:$0xff]  ;;  %v521_v30 = vld [vmem:[%s705_s1 + $0x80] sm:$0xff]  ;;  %v17_v38 = vld [vmem:[%s707_s0 + $0x18] sm:$0xff]  ;;  %v28_v42 = vpack.c.bf16 %v20_v37, %v16_v36 }
   0xc   :  { %332 = vmatpush.bf16.msra.mxu2 %v526_v10  ;;  %v530_v27 = vld [vmem:[%s705_s1 + $0xc8] sm:$0xff]  ;;  %v529_v31 = vld [vmem:[%s705_s1 + $0xc0] sm:$0xff]  ;;  %v21_v39 = vld [vmem:[%s707_s0 + $0x38] sm:$0xff] }
   0xd   :  { %350 = vmatpush.bf16.msra.mxu3 %v534_v11  ;;  %v14_v32 = vld [vmem:[%s707_s0] sm:$0xff]  ;;  %v15_v34 = vld [vmem:[%s707_s0 + $0x8] sm:$0xff]  ;;  %v29_v43 = vpack.c.bf16 %v21_v39, %v17_v38  ;;  %v24_v46 = vld [vmem:[%s707_s0 + $0x50] sm:$0xff] }
   0xe   :  { %297 = vmatpush.bf16.msra.mxu0 %v509_v12  ;;  %v18_v33 = vld [vmem:[%s707_s0 + $0x20] sm:$0xff]  ;;  %v19_v35 = vld [vmem:[%s707_s0 + $0x28] sm:$0xff]  ;;  %v25_v47 = vld [vmem:[%s707_s0 + $0x58] sm:$0xff]  ;;  %v32_v50 = vpack.c.bf16 %v24_v46, %v24_v46 }
   0xf   :  { %315 = vmatpush.bf16.msra.mxu1 %v517_v13  ;;  %v26_v40 = vpack.c.bf16 %v18_v33, %v14_v32  ;;  %v27_v41 = vpack.c.bf16 %v19_v35, %v15_v34  ;;  %v22_v44 = vld [vmem:[%s707_s0 + $0x40] sm:$0xff]  ;;  %v23_v45 = vld [vmem:[%s707_s0 + $0x48] sm:$0xff]  ;;  %v33_v51 = vpack.c.bf16 %v25_v47, %v25_v47 }
  0x10   :  { %333 = vmatpush.bf16.msra.mxu2 %v525_v14  ;;  %v30_v48 = vpack.c.bf16 %v22_v44, %v22_v44  ;;  %v31_v49 = vpack.c.bf16 %v23_v45, %v23_v45  ;;  %v537_v52 = vld [vmem:[%s706_s2] ss:$0 sm:$0xff] }
  0x11   :  { %351 = vmatpush.bf16.msra.mxu3 %v533_v15 }
  0x12   :  { %298 = vmatpush.bf16.msra.mxu0 %v508_v16 }
  0x13   :  { %316 = vmatpush.bf16.msra.mxu1 %v516_v17 }
  0x14   :  { %334 = vmatpush.bf16.msra.mxu2 %v524_v18 }
  0x15   :  { %352 = vmatpush.bf16.msra.mxu3 %v532_v19 }
  0x16   :  { %299 = vmatpush.bf16.msra.mxu0 %v507_v20 }
  0x17   :  { %317 = vmatpush.bf16.msra.mxu1 %v515_v21 }
  0x18   :  { %335 = vmatpush.bf16.msra.mxu2 %v523_v22 }
  0x19   :  { %353 = vmatpush.bf16.msra.mxu3 %v531_v23 }
  0x1a   :  { %300 = vmatpush.bf16.msra.mxu0 %v506_v24 }
  0x1b   :  { %318 = vmatpush.bf16.msra.mxu1 %v514_v25 }
  0x1c   :  { %336 = vmatpush.bf16.msra.mxu2 %v522_v26 }
  0x1d   :  { %354 = vmatpush.bf16.msra.mxu3 %v530_v27 }
  0x1e   :  { %301 = vmatpush.bf16.msra.mxu0 %v505_v28 }
  0x1f   :  { %319 = vmatpush.bf16.msra.mxu1 %v513_v29 }
  0x20   :  { %337 = vmatpush.bf16.msra.mxu2 %v521_v30 }
  0x21   :  { %355 = vmatpush.bf16.msra.mxu3 %v529_v31  ;;  %302 = vmatmul.bf16.vlgmr.msra.gmra.mxu0 %v26_v40 }
  0x22   :  { %320 = vmatmul.bf16.vlgmr.msra.gmra.mxu1 %v27_v41 }
  0x23   :  { %338 = vmatmul.bf16.vlgmr.msra.gmra.mxu2 %v28_v42 }
  0x24   :  { %356 = vmatmul.bf16.vlgmr.msra.gmra.mxu3 %v29_v43 }
  0x31   :  { %307 = vmatmul.bf16.gmra.mxu0 %v30_v48 }
  0x32   :  { %325 = vmatmul.bf16.gmra.mxu1 %v31_v49 }
  0x33   :  { %343 = vmatmul.bf16.gmra.mxu2 %v32_v50 }
  0x34   :  { %361 = vmatmul.bf16.gmra.mxu3 %v33_v51 }
  0x9e   :  { %v303_v53 = vpop.f32.mrf.mxu0 }
  0x9f   :  { %v321_v54 = vpop.f32.mrf.mxu1  ;;  %v304_v55 = vadd.f32 %v537_v52, %v303_v53 }
  0xa1   :  { %v322_v56 = vadd.f32 %v321_v54, %v304_v55 }
  0xa6   :  { %v339_v57 = vpop.f32.mrf.mxu2  ;;  %v305_v60 = vpop.f32.mrf.mxu0 }
  0xa7   :  { %v357_v58 = vpop.f32.mrf.mxu3  ;;  %v340_v59 = vadd.f32 %v339_v57, %v322_v56  ;;  %v323_v61 = vpop.f32.mrf.mxu1  ;;  %v306_v63 = vadd.f32 %v537_v52, %v305_v60 }
  0xa9   :  { %v358_v62 = vadd.f32 %v357_v58, %v340_v59  ;;  %v324_v1 = vadd.f32 %v323_v61, %v306_v63 }
  0xab   :  { %v366_v0 = vmax.f32 %v358_v62, 0.0 }
  0xad   :  { %370 = vst.msk [vmem:[%s708_s3] sm:$0xff] %vm369_vm0, %v366_v0 }
  0xae   :  { %v341_v2 = vpop.f32.mrf.mxu2  ;;  %v308_v5 = vpop.f32.mrf.mxu0 }
  0xaf   :  { %v359_v3 = vpop.f32.mrf.mxu3  ;;  %v342_v4 = vadd.f32 %v341_v2, %v324_v1  ;;  %v326_v6 = vpop.f32.mrf.mxu1  ;;  %v309_v7 = vadd.f32 %v537_v52, %v308_v5 }
  0xb1   :  { %v360_v8 = vadd.f32 %v359_v3, %v342_v4  ;;  %v327_v10 = vadd.f32 %v326_v6, %v309_v7 }
  0xb3   :  { %v367_v9 = vmax.f32 %v360_v8, 0.0 }
  0xb5   :  { %371 = vst.msk [vmem:[%s708_s3 + $0x8] sm:$0xff] %vm369_vm0, %v367_v9 }
  0xb6   :  { %v344_v11 = vpop.f32.mrf.mxu2  ;;  %v310_v14 = vpop.f32.mrf.mxu0 }
  0xb7   :  { %v362_v12 = vpop.f32.mrf.mxu3  ;;  %v345_v13 = vadd.f32 %v344_v11, %v327_v10  ;;  %v328_v15 = vpop.f32.mrf.mxu1 }
  0xb9   :  { %v363_v16 = vadd.f32 %v362_v12, %v345_v13 }
  0xbb   :  { %v368_v17 = vmax.f32 %v363_v16, 0.0 }
  0xbd   :  { %372 = vst.msk [vmem:[%s708_s3 + $0x10] sm:$0xff] %vm369_vm0, %v368_v17 }
  0xbe   :  { %v346_v18 = vpop.f32.mrf.mxu2 }
  0xbf   :  { %v364_v19 = vpop.f32.mrf.mxu3 }

// kernel: dqn_forward.6
= control target key start
LH: loop header
LB: loop body
LE: loop exit
PB: predicated region body
PF: predicated region fallthrough
CT: control target
= control target key end

     0   :  { %vm353_vm0 = vcmask 523264   ;;  %s807_s0 = inlined_call_operand.vmem [shape: f32[2,576], index: 0, kind: input, shape index: {}]   ;;  %s808_s1 = inlined_call_operand.vmem [shape: bf16[576,64], index: 1, kind: input, shape index: {}]   ;;  %s809_s2 = inlined_call_operand.vmem [shape: f32[1,64], index: 2, kind: input, shape index: {}]   ;;  %s810_s3 = inlined_call_operand.vmem [shape: f32[2,64], index: 3, kind: output, shape index: {}]  }
   0x1   :  { %v617_v0 = vld [vmem:[%s808_s1 + $0x38] sm:$0xff]  ;;  %v616_v4 = vld [vmem:[%s808_s1 + $0x30] sm:$0xff]  ;;  %v615_v8 = vld [vmem:[%s808_s1 + $0x28] sm:$0xff] }
   0x2   :  { %v633_v1 = vld [vmem:[%s808_s1 + $0xb8] sm:$0xff]  ;;  %357 = vmatpush.bf16.msra.mxu0 %v617_v0  ;;  %v632_v5 = vld [vmem:[%s808_s1 + $0xb0] sm:$0xff]  ;;  %v631_v9 = vld [vmem:[%s808_s1 + $0xa8] sm:$0xff] }
   0x3   :  { %v641_v2 = vld [vmem:[%s808_s1 + $0xf8] sm:$0xff]  ;;  %383 = vmatpush.bf16.msra.mxu2 %v633_v1  ;;  %v640_v6 = vld [vmem:[%s808_s1 + $0xf0] sm:$0xff]  ;;  %v639_v10 = vld [vmem:[%s808_s1 + $0xe8] sm:$0xff] }
   0x4   :  { %v625_v3 = vld [vmem:[%s808_s1 + $0x78] sm:$0xff]  ;;  %396 = vmatpush.bf16.msra.mxu3 %v641_v2  ;;  %v624_v7 = vld [vmem:[%s808_s1 + $0x70] sm:$0xff]  ;;  %v623_v11 = vld [vmem:[%s808_s1 + $0x68] sm:$0xff] }
   0x5   :  { %370 = vmatpush.bf16.msra.mxu1 %v625_v3  ;;  %v614_v12 = vld [vmem:[%s808_s1 + $0x20] sm:$0xff]  ;;  %v17_v17 = vld [vmem:[%s807_s0 + $0xa] sm:$0xff]  ;;  %v19_v18 = vld [vmem:[%s807_s0 + $0x14] sm:$0xff] }
   0x6   :  { %358 = vmatpush.bf16.msra.mxu0 %v616_v4  ;;  %v630_v13 = vld [vmem:[%s808_s1 + $0xa0] sm:$0xff]  ;;  %v613_v20 = vld [vmem:[%s808_s1 + $0x18] sm:$0xff]  ;;  %33 = vst [vmem:[#allocation1 + $0x1] ss:$4 sm:$0xff] %v17_v17  ;;  %v16_v24 = vld [vmem:[%s807_s0 + $0x8] sm:$0x3] }
   0x7   :  { %384 = vmatpush.bf16.msra.mxu2 %v632_v5  ;;  %v638_v14 = vld [vmem:[%s808_s1 + $0xe0] sm:$0xff]  ;;  %v629_v21 = vld [vmem:[%s808_s1 + $0x98] sm:$0xff]  ;;  %35 = vst [vmem:[#allocation1 + $0x2] ss:$4 sm:$0xff] %v19_v18  ;;  %v18_v25 = vld [vmem:[%s807_s0 + $0x12] sm:$0x3] }
   0x8   :  { %397 = vmatpush.bf16.msra.mxu3 %v640_v6  ;;  %v622_v15 = vld [vmem:[%s808_s1 + $0x60] sm:$0xff]  ;;  %v637_v22 = vld [vmem:[%s808_s1 + $0xd8] sm:$0xff]  ;;  %39 = vst [vmem:[#allocation1 + $0x20] ss:$4 sm:$0xff] %v16_v24  ;;  %v612_v28 = vld [vmem:[%s808_s1 + $0x10] sm:$0xff] }
   0x9   :  { %371 = vmatpush.bf16.msra.mxu1 %v624_v7  ;;  %v15_v16 = vld [vmem:[%s807_s0] sm:$0xff]  ;;  %v621_v23 = vld [vmem:[%s808_s1 + $0x58] sm:$0xff]  ;;  %41 = vst [vmem:[#allocation1 + $0x21] ss:$4 sm:$0xff] %v18_v25  ;;  %v628_v29 = vld [vmem:[%s808_s1 + $0x90] sm:$0xff] }
   0xa   :  { %359 = vmatpush.bf16.msra.mxu0 %v615_v8  ;;  %v21_v19 = vld [vmem:[%s807_s0 + $0x1e] sm:$0xff]  ;;  %31 = vst [vmem:[#allocation1] ss:$4 sm:$0xff] %v15_v16  ;;  %v20_v26 = vld [vmem:[%s807_s0 + $0x1c] sm:$0x3]  ;;  %v636_v30 = vld [vmem:[%s808_s1 + $0xd0] sm:$0xff] }
   0xb   :  { %385 = vmatpush.bf16.msra.mxu2 %v631_v9  ;;  %37 = vst [vmem:[#allocation1 + $0x3] ss:$4 sm:$0xff] %v21_v19  ;;  %v22_v27 = vld [vmem:[%s807_s0 + $0x26] sm:$0x3]  ;;  %v620_v31 = vld [vmem:[%s808_s1 + $0x50] sm:$0xff]  ;;  %v611_v32 = vld [vmem:[%s808_s1 + $0x8] sm:$0xff] }
   0xc   :  { %398 = vmatpush.bf16.msra.mxu3 %v639_v10  ;;  %43 = vst [vmem:[#allocation1 + $0x22] ss:$4 sm:$0xff] %v20_v26  ;;  %v627_v33 = vld [vmem:[%s808_s1 + $0x88] sm:$0xff]  ;;  %v610_v36 = vld [vmem:[%s808_s1] sm:$0xff]  ;;  %v645_v44 = vld [vmem:[%s808_s1 + $0x118] sm:$0xff] }
   0xd   :  { %372 = vmatpush.bf16.msra.mxu1 %v623_v11  ;;  %45 = vst [vmem:[#allocation1 + $0x23] ss:$4 sm:$0xff] %v22_v27  ;;  %v635_v34 = vld [vmem:[%s808_s1 + $0xc8] sm:$0xff]  ;;  %v626_v37 = vld [vmem:[%s808_s1 + $0x80] sm:$0xff]  ;;  %v644_v49 = vld [vmem:[%s808_s1 + $0x110] sm:$0xff] }
   0xe   :  { %360 = vmatpush.bf16.msra.mxu0 %v614_v12  ;;  %v619_v35 = vld [vmem:[%s808_s1 + $0x48] sm:$0xff]  ;;  %v634_v38 = vld [vmem:[%s808_s1 + $0xc0] sm:$0xff] }
   0xf   :  { %386 = vmatpush.bf16.msra.mxu2 %v630_v13  ;;  %v618_v39 = vld [vmem:[%s808_s1 + $0x40] sm:$0xff]  ;;  %v643_v50 = vld [vmem:[%s808_s1 + $0x108] sm:$0xff] }
  0x10   :  { %399 = vmatpush.bf16.msra.mxu3 %v638_v14  ;;  %v642_v51 = vld [vmem:[%s808_s1 + $0x100] sm:$0xff] }
  0x11   :  { %373 = vmatpush.bf16.msra.mxu1 %v622_v15  ;;  %v646_v55 = vld [vmem:[%s809_s2] ss:$0 sm:$0xff] }
  0x12   :  { %361 = vmatpush.bf16.msra.mxu0 %v613_v20  ;;  %v46_v40 = vld.sshfl [vmem:[#allocation1] sm:$0xff pattern:$0x73625140]  ;;  %v48_v41 = vld.sshfl [vmem:[#allocation1 + $0x10] sm:$0xff pattern:$0x73625140] }
  0x13   :  { %387 = vmatpush.bf16.msra.mxu2 %v629_v21  ;;  %v49_v42 = vld.sshfl [vmem:[#allocation1 + $0x18] sm:$0xff pattern:$0x73625140]  ;;  %v47_v43 = vld.sshfl [vmem:[#allocation1 + $0x8] sm:$0xff pattern:$0x73625140]  ;;  %v56_v45 = vpack.c.bf16 %v46_v40, %v46_v40  ;;  %v58_v46 = vpack.c.bf16 %v48_v41, %v48_v41 }
  0x14   :  { %400 = vmatpush.bf16.msra.mxu3 %v637_v22  ;;  %v59_v47 = vpack.c.bf16 %v49_v42, %v49_v42  ;;  %v57_v48 = vpack.c.bf16 %v47_v43, %v47_v43  ;;  %v50_v52 = vld.sshfl [vmem:[#allocation1 + $0x20] sm:$0xff pattern:$0x73625140] }
  0x15   :  { %374 = vmatpush.bf16.msra.mxu1 %v621_v23  ;;  %v60_v53 = vpack.c.bf16 %v50_v52, %v50_v52 }
  0x16   :  { %362 = vmatpush.bf16.msra.mxu0 %v612_v28 }
  0x17   :  { %388 = vmatpush.bf16.msra.mxu2 %v628_v29 }
  0x18   :  { %401 = vmatpush.bf16.msra.mxu3 %v636_v30 }
  0x19   :  { %375 = vmatpush.bf16.msra.mxu1 %v620_v31 }
  0x1a   :  { %363 = vmatpush.bf16.msra.mxu0 %v611_v32 }
  0x1b   :  { %389 = vmatpush.bf16.msra.mxu2 %v627_v33 }
  0x1c   :  { %402 = vmatpush.bf16.msra.mxu3 %v635_v34 }
  0x1d   :  { %376 = vmatpush.bf16.msra.mxu1 %v619_v35 }
  0x1e   :  { %364 = vmatpush.bf16.msra.mxu0 %v610_v36 }
  0x1f   :  { %390 = vmatpush.bf16.msra.mxu2 %v626_v37 }
  0x20   :  { %403 = vmatpush.bf16.msra.mxu3 %v634_v38 }
  0x21   :  { %377 = vmatpush.bf16.msra.mxu1 %v618_v39  ;;  %365 = vmatmul.bf16.vlgmr.msra.gmra.mxu0 %v56_v45 }
  0x22   :  { %413 = vmatpush.bf16.msrb.mxu0 %v645_v44  ;;  %391 = vmatmul.bf16.vlgmr.msra.gmra.mxu2 %v58_v46 }
  0x23   :  { %404 = vmatmul.bf16.vlgmr.msra.gmra.mxu3 %v59_v47 }
  0x24   :  { %378 = vmatmul.bf16.vlgmr.msra.gmra.mxu1 %v57_v48 }
  0x26   :  { %414 = vmatpush.bf16.msrb.mxu0 %v644_v49 }
  0x2a   :  { %415 = vmatpush.bf16.msrb.mxu0 %v643_v50 }
  0x2e   :  { %416 = vmatpush.bf16.msrb.mxu0 %v642_v51 }
  0x31   :  { %609 = vmatmul.msk.bf16.vlgmr.msrb.gmra.mxu0 %vm353_vm0, %v60_v53 }
  0x9e   :  { %v366_v54 = vpop.f32.mrf.mxu0 }
  0x9f   :  { %v367_v57 = vadd.f32 %v646_v55, %v366_v54 }
  0xa1   :  { %v379_v56 = vpop.f32.mrf.mxu1 }
  0xa2   :  { %v380_v61 = vadd.f32 %v379_v56, %v367_v57 }
  0xa5   :  { %v392_v58 = vpop.f32.mrf.mxu2 }
  0xa6   :  { %v405_v59 = vpop.f32.mrf.mxu3  ;;  %v368_v60 = vpop.f32.mrf.mxu0  ;;  %v393_v63 = vadd.f32 %v392_v58, %v380_v61 }
  0xa8   :  { %v406_v1 = vadd.f32 %v405_v59, %v393_v63 }
  0xa9   :  { %v381_v62 = vpop.f32.mrf.mxu1 }
  0xad   :  { %v394_v0 = vpop.f32.mrf.mxu2 }
  0xae   :  { %v407_v2 = vpop.f32.mrf.mxu3  ;;  %v418_v3 = vpop.f32.mrf.mxu0 }
  0xaf   :  { %v419_v4 = vadd.f32 %v418_v3, %v406_v1 }
  0xb1   :  { %v422_v5 = vmax.f32 %v419_v4, 0.0 }
  0xb3   :  { %423 = vst.msk [vmem:[#allocation2] sm:$0xff] %vm353_vm0, %v422_v5 }
  0xb6   :  { %v420_v6 = vpop.f32.mrf.mxu0 }
  0xba   :  { %v442_v7 = vld [vmem:[#allocation2] sm:$0x3] }
  0xbb   :  { %443 = vst [vmem:[%s810_s3] sm:$0x3] %v442_v7 }

// kernel: dqn_forward.7
= control target key start
LH: loop header
LB: loop body
LE: loop exit
PB: predicated region body
PF: predicated region fallthrough
CT: control target
= control target key end

     0   :  { %10 = vsyncpa [#allocation3], 0  ;;  %vm234_vm0 = vcmask 523264   ;;  %vm978_vm1 = vcmask 48128   ;;  %s1963_s0 = inlined_call_operand.vmem [shape: f32[2,64], index: 0, kind: input, shape index: {}]   ;;  %s1964_s1 = inlined_call_operand.vmem [shape: bf16[64,1024], index: 1, kind: input, shape index: {}]   ;;  %s1965_s2 = inlined_call_operand.vmem [shape: f32[1,1024], index: 2, kind: input, shape index: {}]   ;;  %s1966_s3 = inlined_call_operand.vmem [shape: bf16[1024,6], index: 3, kind: input, shape index: {}]   ;;  %s1967_s4 = inlined_call_operand.vmem [shape: f32[1,6], index: 4, kind: input, shape index: {}]   ;;  %s1968_s5 = inlined_call_operand.hbm [shape: f32[2,6], index: 5, kind: output, shape index: {}]  }
   0x1   :  { %v1096_v0 = vld [vmem:[%s1964_s1 + $0xc0] sm:$0xf]  ;;  %v1104_v3 = vld [vmem:[%s1964_s1 + $0xc8] sm:$0xf]  ;;  %v1415_v5 = vld [vmem:[%s1964_s1 + $0xcc] sm:$0xf] }
   0x2   :  { %v1418_v1 = vld [vmem:[%s1964_s1 + $0xdc] sm:$0xf0]  ;;  %v1419_v4 = vld [vmem:[%s1964_s1 + $0xe4] sm:$0xf0]  ;;  %v1106_v7 = vld [vmem:[%s1964_s1 + $0xe8] sm:$0xf0] }
   0x3   :  { %v1097_v2 = vor.u32 %v1418_v1, %v1096_v0  ;;  %v1105_v6 = vor.u32 %v1419_v4, %v1104_v3  ;;  %v1414_v8 = vld [vmem:[%s1964_s1 + $0xc4] sm:$0xf]  ;;  %v1109_v10 = vor.u32 %v1415_v5, %v1106_v7  ;;  %v1064_v12 = vld [vmem:[%s1964_s1 + $0x80] sm:$0xf]  ;;  %v1072_v14 = vld [vmem:[%s1964_s1 + $0x88] sm:$0xf] }
   0x4   :  { %v1098_v9 = vld [vmem:[%s1964_s1 + $0xe0] sm:$0xf0]  ;;  %v1410_v13 = vld [vmem:[%s1964_s1 + $0x9c] sm:$0xf0]  ;;  %v1411_v16 = vld [vmem:[%s1964_s1 + $0xa4] sm:$0xf0] }
   0x5   :  { %242 = vmatpush.bf16.msra.mxu0 %v1097_v2  ;;  %v1101_v11 = vor.u32 %v1414_v8, %v1098_v9  ;;  %268 = vmatpush.bf16.msra.mxu2 %v1105_v6  ;;  %v1065_v15 = vor.u32 %v1410_v13, %v1064_v12  ;;  %v1407_v17 = vld [vmem:[%s1964_s1 + $0x8c] sm:$0xf]  ;;  %v1073_v19 = vor.u32 %v1411_v16, %v1072_v14  ;;  %v1406_v21 = vld [vmem:[%s1964_s1 + $0x84] sm:$0xf]  ;;  %v1032_v23 = vld [vmem:[%s1964_s1 + $0x40] sm:$0xf] }
   0x6   :  { %v1074_v18 = vld [vmem:[%s1964_s1 + $0xa8] sm:$0xf0]  ;;  %281 = vmatpush.bf16.msra.mxu3 %v1109_v10  ;;  %v1066_v22 = vld [vmem:[%s1964_s1 + $0xa0] sm:$0xf0]  ;;  %v1402_v25 = vld [vmem:[%s1964_s1 + $0x5c] sm:$0xf0] }
   0x7   :  { %255 = vmatpush.bf16.msra.mxu1 %v1101_v11  ;;  %v1077_v20 = vor.u32 %v1407_v17, %v1074_v18  ;;  %v1069_v24 = vor.u32 %v1406_v21, %v1066_v22  ;;  %v1040_v26 = vld [vmem:[%s1964_s1 + $0x48] sm:$0xf]  ;;  %v1033_v28 = vor.u32 %v1402_v25, %v1032_v23  ;;  %v1399_v29 = vld [vmem:[%s1964_s1 + $0x4c] sm:$0xf]  ;;  %v1398_v31 = vld [vmem:[%s1964_s1 + $0x44] sm:$0xf] }
   0x8   :  { %v1403_v27 = vld [vmem:[%s1964_s1 + $0x64] sm:$0xf0]  ;;  %v1042_v30 = vld [vmem:[%s1964_s1 + $0x68] sm:$0xf0]  ;;  %v1034_v33 = vld [vmem:[%s1964_s1 + $0x60] sm:$0xf0] }
   0x9   :  { %243 = vmatpush.bf16.msra.mxu0 %v1065_v15  ;;  %269 = vmatpush.bf16.msra.mxu2 %v1073_v19  ;;  %v1041_v32 = vor.u32 %v1403_v27, %v1040_v26  ;;  %v1000_v34 = vld [vmem:[%s1964_s1] sm:$0xf]  ;;  %v1045_v36 = vor.u32 %v1399_v29, %v1042_v30  ;;  %v1037_v37 = vor.u32 %v1398_v31, %v1034_v33  ;;  %v1008_v38 = vld [vmem:[%s1964_s1 + $0x8] sm:$0xf]  ;;  %v1391_v40 = vld [vmem:[%s1964_s1 + $0xc] sm:$0xf] }
   0xa   :  { %v1394_v35 = vld [vmem:[%s1964_s1 + $0x1c] sm:$0xf0]  ;;  %282 = vmatpush.bf16.msra.mxu3 %v1077_v20  ;;  %v1395_v39 = vld [vmem:[%s1964_s1 + $0x24] sm:$0xf0]  ;;  %v1010_v41 = vld [vmem:[%s1964_s1 + $0x28] sm:$0xf0] }
   0xb   :  { %256 = vmatpush.bf16.msra.mxu1 %v1069_v24  ;;  %v1390_v42 = vld [vmem:[%s1964_s1 + $0x4] sm:$0xf]  ;;  %v1001_v44 = vor.u32 %v1394_v35, %v1000_v34  ;;  %v1120_v46 = vld [vmem:[%s1964_s1 + $0xd8] sm:$0xf]  ;;  %v1009_v48 = vor.u32 %v1395_v39, %v1008_v38  ;;  %v1417_v49 = vld [vmem:[%s1964_s1 + $0xdc] sm:$0xf]  ;;  %v1013_v52 = vor.u32 %v1391_v40, %v1010_v41 }
   0xc   :  { %v1002_v43 = vld [vmem:[%s1964_s1 + $0x20] sm:$0xf0]  ;;  %v1421_v47 = vld [vmem:[%s1964_s1 + $0xf4] sm:$0xf0]  ;;  %v1122_v50 = vld [vmem:[%s1964_s1 + $0xf8] sm:$0xf0] }
   0xd   :  { %244 = vmatpush.bf16.msra.mxu0 %v1033_v28  ;;  %v22_v45 = vld [vmem:[%s1963_s0] sm:$0xff]  ;;  %270 = vmatpush.bf16.msra.mxu2 %v1041_v32  ;;  %v1112_v51 = vld [vmem:[%s1964_s1 + $0xd0] sm:$0xf]  ;;  %v1005_v53 = vor.u32 %v1390_v42, %v1002_v43  ;;  %v1121_v56 = vor.u32 %v1421_v47, %v1120_v46  ;;  %v1416_v58 = vld [vmem:[%s1964_s1 + $0xd4] sm:$0xf]  ;;  %v1125_v61 = vor.u32 %v1417_v49, %v1122_v50 }
   0xe   :  { %283 = vmatpush.bf16.msra.mxu3 %v1045_v36  ;;  %v1420_v54 = vld [vmem:[%s1964_s1 + $0xec] sm:$0xf0]  ;;  %v1666_v55 = vpack.c.bf16 %v22_v45, %v22_v45  ;;  %v1114_v59 = vld [vmem:[%s1964_s1 + $0xf0] sm:$0xf0]  ;;  %v1088_v60 = vld [vmem:[%s1964_s1 + $0x98] sm:$0xf] }
   0xf   :  { %257 = vmatpush.bf16.msra.mxu1 %v1037_v37  ;;  %v1113_v57 = vor.u32 %v1420_v54, %v1112_v51  ;;  %v1413_v62 = vld [vmem:[%s1964_s1 + $0xb4] sm:$0xf0]  ;;  %v1080_v63 = vld [vmem:[%s1964_s1 + $0x90] sm:$0xf]  ;;  %v1409_v1 = vld [vmem:[%s1964_s1 + $0x9c] sm:$0xf]  ;;  %v1117_v3 = vor.u32 %v1416_v58, %v1114_v59 }
  0x10   :  { %v1412_v0 = vld [vmem:[%s1964_s1 + $0xac] sm:$0xf0]  ;;  %v1090_v2 = vld [vmem:[%s1964_s1 + $0xb8] sm:$0xf0]  ;;  %v1408_v5 = vld [vmem:[%s1964_s1 + $0x94] sm:$0xf]  ;;  %v1089_v6 = vor.u32 %v1413_v62, %v1088_v60 }
  0x11   :  { %245 = vmatpush.bf16.msra.mxu0 %v1001_v44  ;;  %271 = vmatpush.bf16.msra.mxu2 %v1009_v48  ;;  %v1081_v4 = vor.u32 %v1412_v0, %v1080_v63  ;;  %v1082_v7 = vld [vmem:[%s1964_s1 + $0xb0] sm:$0xf0]  ;;  %v1048_v8 = vld [vmem:[%s1964_s1 + $0x50] sm:$0xf]  ;;  %v1093_v10 = vor.u32 %v1409_v1, %v1090_v2  ;;  %v1056_v11 = vld [vmem:[%s1964_s1 + $0x58] sm:$0xf] }
  0x12   :  { %284 = vmatpush.bf16.msra.mxu3 %v1013_v52  ;;  %v1404_v9 = vld [vmem:[%s1964_s1 + $0x6c] sm:$0xf0]  ;;  %v1405_v12 = vld [vmem:[%s1964_s1 + $0x74] sm:$0xf0]  ;;  %v1401_v13 = vld [vmem:[%s1964_s1 + $0x5c] sm:$0xf]  ;;  %v1085_v15 = vor.u32 %v1408_v5, %v1082_v7 }
  0x13   :  { %258 = vmatpush.bf16.msra.mxu1 %v1005_v53  ;;  %v1058_v14 = vld [vmem:[%s1964_s1 + $0x78] sm:$0xf0]  ;;  %v1049_v16 = vor.u32 %v1404_v9, %v1048_v8  ;;  %v1400_v17 = vld [vmem:[%s1964_s1 + $0x54] sm:$0xf]  ;;  %v1057_v18 = vor.u32 %v1405_v12, %v1056_v11  ;;  %v1016_v20 = vld [vmem:[%s1964_s1 + $0x10] sm:$0xf] }
  0x14   :  { %1126 = vmatmul.msk.bf16.vlgmr.msra.gmra.mxu0 %vm234_vm0, %v1666_v55  ;;  %1128 = vmatmul.msk.bf16.vlgmr.msra.gmra.mxu2 %vm234_vm0, %v1666_v55  ;;  %v1050_v19 = vld [vmem:[%s1964_s1 + $0x70] sm:$0xf0]  ;;  %v1396_v21 = vld [vmem:[%s1964_s1 + $0x2c] sm:$0xf0]  ;;  %v1061_v22 = vor.u32 %v1401_v13, %v1058_v14  ;;  %v1024_v23 = vld [vmem:[%s1964_s1 + $0x18] sm:$0xf] }
  0x15   :  { %294 = vmatpush.bf16.msrb.mxu0 %v1113_v57  ;;  %320 = vmatpush.bf16.msrb.mxu2 %v1121_v56  ;;  %v1397_v24 = vld [vmem:[%s1964_s1 + $0x34] sm:$0xf0]  ;;  %v1393_v25 = vld [vmem:[%s1964_s1 + $0x1c] sm:$0xf]  ;;  %v1053_v27 = vor.u32 %v1400_v17, %v1050_v19  ;;  %v1017_v28 = vor.u32 %v1396_v21, %v1016_v20  ;;  %v1392_v30 = vld [vmem:[%s1964_s1 + $0x14] sm:$0xf] }
  0x16   :  { %333 = vmatpush.bf16.msrb.mxu3 %v1125_v61  ;;  %1127 = vmatmul.msk.bf16.vlgmr.msra.gmra.mxu1 %vm234_vm0, %v1666_v55  ;;  %v1026_v26 = vld [vmem:[%s1964_s1 + $0x38] sm:$0xf0]  ;;  %v1025_v29 = vor.u32 %v1397_v24, %v1024_v23  ;;  %v1018_v31 = vld [vmem:[%s1964_s1 + $0x30] sm:$0xf0]  ;;  %v1427_v42 = vld [vmem:[%s1966_s3 + $0x28] sm:$0xff] }
  0x17   :  { %1129 = vmatmul.msk.bf16.vlgmr.msra.gmra.mxu3 %vm234_vm0, %v1666_v55  ;;  %307 = vmatpush.bf16.msrb.mxu1 %v1117_v3  ;;  %v1429_v32 = vld [vmem:[%s1966_s3 + $0x38] sm:$0xff]  ;;  %v1029_v33 = vor.u32 %v1393_v25, %v1026_v26  ;;  %v1021_v36 = vor.u32 %v1392_v30, %v1018_v31  ;;  %v1428_v38 = vld [vmem:[%s1966_s3 + $0x30] sm:$0xff]  ;;  %v1443_v43 = vld [vmem:[%s1966_s3 + $0xa8] sm:$0xff] }
  0x18   :  { %v1445_v34 = vld [vmem:[%s1966_s3 + $0xb8] sm:$0xff]  ;;  %v1444_v39 = vld [vmem:[%s1966_s3 + $0xb0] sm:$0xff]  ;;  %v1451_v44 = vld [vmem:[%s1966_s3 + $0xe8] sm:$0xff] }
  0x19   :  { %295 = vmatpush.bf16.msrb.mxu0 %v1081_v4  ;;  %321 = vmatpush.bf16.msrb.mxu2 %v1089_v6  ;;  %v1453_v35 = vld [vmem:[%s1966_s3 + $0xf8] sm:$0xff]  ;;  %v1452_v40 = vld [vmem:[%s1966_s3 + $0xf0] sm:$0xff]  ;;  %v1435_v45 = vld [vmem:[%s1966_s3 + $0x68] sm:$0xff] }
  0x1a   :  { %334 = vmatpush.bf16.msrb.mxu3 %v1093_v10  ;;  %v1437_v37 = vld [vmem:[%s1966_s3 + $0x78] sm:$0xff]  ;;  %v1436_v41 = vld [vmem:[%s1966_s3 + $0x70] sm:$0xff]  ;;  %v1426_v46 = vld [vmem:[%s1966_s3 + $0x20] sm:$0xff] }
  0x1b   :  { %308 = vmatpush.bf16.msrb.mxu1 %v1085_v15  ;;  %v1442_v47 = vld [vmem:[%s1966_s3 + $0xa0] sm:$0xff]  ;;  %v1425_v50 = vld [vmem:[%s1966_s3 + $0x18] sm:$0xff]  ;;  %v1424_v54 = vld [vmem:[%s1966_s3 + $0x10] sm:$0xff] }
  0x1c   :  { %v1450_v48 = vld [vmem:[%s1966_s3 + $0xe0] sm:$0xff]  ;;  %v1441_v51 = vld [vmem:[%s1966_s3 + $0x98] sm:$0xff]  ;;  %v1448_v56 = vld [vmem:[%s1966_s3 + $0xd0] sm:$0xff] }
  0x1d   :  { %296 = vmatpush.bf16.msrb.mxu0 %v1049_v16  ;;  %322 = vmatpush.bf16.msrb.mxu2 %v1057_v18  ;;  %v1434_v49 = vld [vmem:[%s1966_s3 + $0x60] sm:$0xff]  ;;  %v1449_v52 = vld [vmem:[%s1966_s3 + $0xd8] sm:$0xff]  ;;  %v1432_v57 = vld [vmem:[%s1966_s3 + $0x50] sm:$0xff] }
  0x1e   :  { %335 = vmatpush.bf16.msrb.mxu3 %v1061_v22  ;;  %v1433_v53 = vld [vmem:[%s1966_s3 + $0x58] sm:$0xff]  ;;  %v1423_v58 = vld [vmem:[%s1966_s3 + $0x8] sm:$0xff]  ;;  %v1422_v62 = vld [vmem:[%s1966_s3] sm:$0xff] }
  0x1f   :  { %309 = vmatpush.bf16.msrb.mxu1 %v1053_v27  ;;  %v1439_v59 = vld [vmem:[%s1966_s3 + $0x88] sm:$0xff]  ;;  %v1461_v63 = vld [vmem:[%s1966_s3 + $0x138] sm:$0xff]  ;;  %v1438_v0 = vld [vmem:[%s1966_s3 + $0x80] sm:$0xff] }
  0x20   :  { %v1447_v60 = vld [vmem:[%s1966_s3 + $0xc8] sm:$0xff]  ;;  %v1446_v1 = vld [vmem:[%s1966_s3 + $0xc0] sm:$0xff]  ;;  %v1477_v3 = vld [vmem:[%s1966_s3 + $0x1b8] sm:$0xff] }
  0x21   :  { %297 = vmatpush.bf16.msrb.mxu0 %v1017_v28  ;;  %323 = vmatpush.bf16.msrb.mxu2 %v1025_v29  ;;  %v1431_v61 = vld [vmem:[%s1966_s3 + $0x48] sm:$0xff]  ;;  %v1430_v2 = vld [vmem:[%s1966_s3 + $0x40] sm:$0xff]  ;;  %v1469_v4 = vld [vmem:[%s1966_s3 + $0x178] sm:$0xff] }
  0x22   :  { %336 = vmatpush.bf16.msrb.mxu3 %v1029_v33  ;;  %v1485_v5 = vld [vmem:[%s1966_s3 + $0x1f8] sm:$0xff]  ;;  %v1460_v6 = vld [vmem:[%s1966_s3 + $0x130] sm:$0xff]  ;;  %v1459_v8 = vld [vmem:[%s1966_s3 + $0x128] sm:$0xff] }
  0x23   :  { %310 = vmatpush.bf16.msrb.mxu1 %v1021_v36  ;;  %v1468_v7 = vld [vmem:[%s1966_s3 + $0x170] sm:$0xff]  ;;  %v1467_v9 = vld [vmem:[%s1966_s3 + $0x168] sm:$0xff]  ;;  %v1458_v12 = vld [vmem:[%s1966_s3 + $0x120] sm:$0xff] }
  0x24   :  { %1130 = vmatmul.msk.bf16.vlgmr.msrb.gmra.mxu0 %vm234_vm0, %v1666_v55  ;;  %1132 = vmatmul.msk.bf16.vlgmr.msrb.gmra.mxu2 %vm234_vm0, %v1666_v55  ;;  %v1476_v10 = vld [vmem:[%s1966_s3 + $0x1b0] sm:$0xff]  ;;  %v1466_v13 = vld [vmem:[%s1966_s3 + $0x160] sm:$0xff]  ;;  %v1475_v14 = vld [vmem:[%s1966_s3 + $0x1a8] sm:$0xff] }
  0x25   :  { %874 = vmatpush.bf16.msra.mxu0 %v1429_v32  ;;  %900 = vmatpush.bf16.msra.mxu2 %v1445_v34  ;;  %v1484_v11 = vld [vmem:[%s1966_s3 + $0x1f0] sm:$0xff]  ;;  %v1483_v15 = vld [vmem:[%s1966_s3 + $0x1e8] sm:$0xff]  ;;  %v1457_v16 = vld [vmem:[%s1966_s3 + $0x118] sm:$0xff] }
  0x26   :  { %913 = vmatpush.bf16.msra.mxu3 %v1453_v35  ;;  %1131 = vmatmul.msk.bf16.vlgmr.msrb.gmra.mxu1 %vm234_vm0, %v1666_v55  ;;  %v1465_v17 = vld [vmem:[%s1966_s3 + $0x158] sm:$0xff]  ;;  %v1474_v18 = vld [vmem:[%s1966_s3 + $0x1a0] sm:$0xff]  ;;  %v1456_v20 = vld [vmem:[%s1966_s3 + $0x110] sm:$0xff] }
  0x27   :  { %887 = vmatpush.bf16.msra.mxu1 %v1437_v37  ;;  %1133 = vmatmul.msk.bf16.vlgmr.msrb.gmra.mxu3 %vm234_vm0, %v1666_v55  ;;  %v1440_v55 = vld [vmem:[%s1966_s3 + $0x90] sm:$0xff]  ;;  %v1482_v19 = vld [vmem:[%s1966_s3 + $0x1e0] sm:$0xff]  ;;  %v1473_v22 = vld [vmem:[%s1966_s3 + $0x198] sm:$0xff] }
  0x28   :  { %v1464_v21 = vld [vmem:[%s1966_s3 + $0x150] sm:$0xff]  ;;  %v1481_v23 = vld [vmem:[%s1966_s3 + $0x1d8] sm:$0xff]  ;;  %v1455_v24 = vld [vmem:[%s1966_s3 + $0x108] sm:$0xff] }
  0x29   :  { %875 = vmatpush.bf16.msra.mxu0 %v1428_v38  ;;  %901 = vmatpush.bf16.msra.mxu2 %v1444_v39  ;;  %v1463_v25 = vld [vmem:[%s1966_s3 + $0x148] sm:$0xff]  ;;  %v1472_v26 = vld [vmem:[%s1966_s3 + $0x190] sm:$0xff]  ;;  %v1454_v28 = vld [vmem:[%s1966_s3 + $0x100] sm:$0xff] }
  0x2a   :  { %914 = vmatpush.bf16.msra.mxu3 %v1452_v40  ;;  %v1480_v27 = vld [vmem:[%s1966_s3 + $0x1d0] sm:$0xff]  ;;  %v1462_v29 = vld [vmem:[%s1966_s3 + $0x140] sm:$0xff]  ;;  %v1471_v30 = vld [vmem:[%s1966_s3 + $0x188] sm:$0xff] }
  0x2b   :  { %888 = vmatpush.bf16.msra.mxu1 %v1436_v41  ;;  %v1479_v31 = vld [vmem:[%s1966_s3 + $0x1c8] sm:$0xff]  ;;  %v56_v32 = vld [vmem:[%s1965_s2] sm:$0xff] }
  0x2c   :  { %v1470_v33 = vld [vmem:[%s1966_s3 + $0x180] sm:$0xff]  ;;  %v58_v35 = vperm.slane %v56_v32, 0  ;;  %v59_v36 = vperm.slane %v56_v32, 1 }
  0x2d   :  { %876 = vmatpush.bf16.msra.mxu0 %v1427_v42  ;;  %902 = vmatpush.bf16.msra.mxu2 %v1443_v43  ;;  %v1478_v34 = vld [vmem:[%s1966_s3 + $0x1c0] sm:$0xff]  ;;  %v60_v42 = vperm.slane %v56_v32, 2 }
  0x2e   :  { %915 = vmatpush.bf16.msra.mxu3 %v1451_v44 }
  0x2f   :  { %889 = vmatpush.bf16.msra.mxu1 %v1435_v45  ;;  %v61_v45 = vperm.slane %v56_v32, 3 }
  0x31   :  { %877 = vmatpush.bf16.msra.mxu0 %v1426_v46  ;;  %903 = vmatpush.bf16.msra.mxu2 %v1442_v47 }
  0x32   :  { %916 = vmatpush.bf16.msra.mxu3 %v1450_v48 }
  0x33   :  { %890 = vmatpush.bf16.msra.mxu1 %v1434_v49 }
  0x35   :  { %878 = vmatpush.bf16.msra.mxu0 %v1425_v50  ;;  %904 = vmatpush.bf16.msra.mxu2 %v1441_v51 }
  0x36   :  { %917 = vmatpush.bf16.msra.mxu3 %v1449_v52 }
  0x37   :  { %891 = vmatpush.bf16.msra.mxu1 %v1433_v53 }
  0x39   :  { %879 = vmatpush.bf16.msra.mxu0 %v1424_v54  ;;  %905 = vmatpush.bf16.msra.mxu2 %v1440_v55 }
  0x3a   :  { %918 = vmatpush.bf16.msra.mxu3 %v1448_v56 }
  0x3b   :  { %892 = vmatpush.bf16.msra.mxu1 %v1432_v57  ;;  %v62_v57 = vperm.slane %v56_v32, 4 }
  0x3d   :  { %880 = vmatpush.bf16.msra.mxu0 %v1423_v58  ;;  %906 = vmatpush.bf16.msra.mxu2 %v1439_v59  ;;  %v63_v59 = vperm.slane %v56_v32, 5 }
  0x3e   :  { %919 = vmatpush.bf16.msra.mxu3 %v1447_v60 }
  0x3f   :  { %893 = vmatpush.bf16.msra.mxu1 %v1431_v61 }
  0x41   :  { %881 = vmatpush.bf16.msra.mxu0 %v1422_v62  ;;  %907 = vmatpush.bf16.msra.mxu2 %v1438_v0 }
  0x42   :  { %920 = vmatpush.bf16.msra.mxu3 %v1446_v1 }
  0x43   :  { %894 = vmatpush.bf16.msra.mxu1 %v1430_v2  ;;  %v64_v2 = vperm.slane %v56_v32, 6 }
  0x45   :  { %926 = vmatpush.bf16.msrb.mxu0 %v1461_v63  ;;  %952 = vmatpush.bf16.msrb.mxu2 %v1477_v3 }
  0x46   :  { %965 = vmatpush.bf16.msrb.mxu3 %v1485_v5  ;;  %v65_v5 = vperm.slane %v56_v32, 7 }
  0x47   :  { %939 = vmatpush.bf16.msrb.mxu1 %v1469_v4 }
  0x49   :  { %927 = vmatpush.bf16.msrb.mxu0 %v1460_v6  ;;  %953 = vmatpush.bf16.msrb.mxu2 %v1476_v10 }
  0x4a   :  { %966 = vmatpush.bf16.msrb.mxu3 %v1484_v11 }
  0x4b   :  { %940 = vmatpush.bf16.msrb.mxu1 %v1468_v7 }
  0x4d   :  { %928 = vmatpush.bf16.msrb.mxu0 %v1459_v8  ;;  %954 = vmatpush.bf16.msrb.mxu2 %v1475_v14 }
  0x4e   :  { %967 = vmatpush.bf16.msrb.mxu3 %v1483_v15 }
  0x4f   :  { %941 = vmatpush.bf16.msrb.mxu1 %v1467_v9 }
  0x51   :  { %929 = vmatpush.bf16.msrb.mxu0 %v1458_v12  ;;  %955 = vmatpush.bf16.msrb.mxu2 %v1474_v18 }
  0x52   :  { %968 = vmatpush.bf16.msrb.mxu3 %v1482_v19 }
  0x53   :  { %942 = vmatpush.bf16.msrb.mxu1 %v1466_v13 }
  0x55   :  { %930 = vmatpush.bf16.msrb.mxu0 %v1457_v16  ;;  %956 = vmatpush.bf16.msrb.mxu2 %v1473_v22 }
  0x56   :  { %969 = vmatpush.bf16.msrb.mxu3 %v1481_v23 }
  0x57   :  { %943 = vmatpush.bf16.msrb.mxu1 %v1465_v17 }
  0x59   :  { %931 = vmatpush.bf16.msrb.mxu0 %v1456_v20  ;;  %957 = vmatpush.bf16.msrb.mxu2 %v1472_v26 }
  0x5a   :  { %970 = vmatpush.bf16.msrb.mxu3 %v1480_v27 }
  0x5b   :  { %944 = vmatpush.bf16.msrb.mxu1 %v1464_v21  ;;  %v1489_v21 = vld [vmem:[%s1967_s4] ss:$0 sm:$0xff] }
  0x5d   :  { %932 = vmatpush.bf16.msrb.mxu0 %v1455_v24  ;;  %958 = vmatpush.bf16.msrb.mxu2 %v1471_v30 }
  0x5e   :  { %971 = vmatpush.bf16.msrb.mxu3 %v1479_v31 }
  0x5f   :  { %945 = vmatpush.bf16.msrb.mxu1 %v1463_v25 }
  0x61   :  { %933 = vmatpush.bf16.msrb.mxu0 %v1454_v28  ;;  %959 = vmatpush.bf16.msrb.mxu2 %v1470_v33 }
  0x62   :  { %972 = vmatpush.bf16.msrb.mxu3 %v1478_v34 }
  0x63   :  { %946 = vmatpush.bf16.msrb.mxu1 %v1462_v29 }
  0x91   :  { %v247_v37 = vpop.f32.mrf.mxu0 }
  0x92   :  { %v248_v38 = vadd.f32 %v247_v37, %v58_v35 }
  0x93   :  { %v260_v39 = vpop.f32.mrf.mxu1 }
  0x94   :  { %v342_v40 = vmax.f32 %v248_v38, 0.0  ;;  %v261_v41 = vadd.f32 %v260_v39, %v59_v36 }
  0x96   :  { %v350_v43 = vpack.c.bf16 %v342_v40, %v342_v40  ;;  %v343_v44 = vmax.f32 %v261_v41, 0.0 }
  0x97   :  { %v273_v47 = vpop.f32.mrf.mxu2 }
  0x98   :  { %v351_v46 = vpack.c.bf16 %v343_v44, %v343_v44  ;;  %882 = vmatmul.bf16.vlgmr.msra.gmra.mxu0 %v350_v43  ;;  %v274_v48 = vadd.f32 %v273_v47, %v60_v42 }
  0x99   :  { %v249_v50 = vpop.f32.mrf.mxu0 }
  0x9a   :  { %v286_v49 = vpop.f32.mrf.mxu3  ;;  %895 = vmatmul.bf16.vlgmr.msra.gmra.mxu1 %v351_v46  ;;  %v344_v52 = vmax.f32 %v274_v48, 0.0 }
  0x9b   :  { %v287_v51 = vadd.f32 %v286_v49, %v61_v45  ;;  %v262_v53 = vpop.f32.mrf.mxu1 }
  0x9c   :  { %v352_v55 = vpack.c.bf16 %v344_v52, %v344_v52 }
  0x9d   :  { %v345_v54 = vmax.f32 %v287_v51, 0.0 }
  0x9e   :  { %908 = vmatmul.bf16.vlgmr.msra.gmra.mxu2 %v352_v55 }
  0x9f   :  { %v353_v56 = vpack.c.bf16 %v345_v54, %v345_v54  ;;  %v275_v58 = vpop.f32.mrf.mxu2 }
  0xa1   :  { %921 = vmatmul.bf16.vlgmr.msra.gmra.mxu3 %v353_v56  ;;  %v299_v61 = vpop.f32.mrf.mxu0 }
  0xa2   :  { %v288_v60 = vpop.f32.mrf.mxu3  ;;  %v300_v62 = vadd.f32 %v299_v61, %v62_v57 }
  0xa3   :  { %v312_v63 = vpop.f32.mrf.mxu1 }
  0xa4   :  { %v346_v0 = vmax.f32 %v300_v62, 0.0  ;;  %v313_v1 = vadd.f32 %v312_v63, %v63_v59 }
  0xa6   :  { %v354_v3 = vpack.c.bf16 %v346_v0, %v346_v0  ;;  %v347_v4 = vmax.f32 %v313_v1, 0.0 }
  0xa7   :  { %v325_v7 = vpop.f32.mrf.mxu2 }
  0xa8   :  { %v355_v6 = vpack.c.bf16 %v347_v4, %v347_v4  ;;  %934 = vmatmul.bf16.vlgmr.msrb.gmra.mxu0 %v354_v3  ;;  %v326_v8 = vadd.f32 %v325_v7, %v64_v2 }
  0xa9   :  { %v301_v10 = vpop.f32.mrf.mxu0 }
  0xaa   :  { %v338_v9 = vpop.f32.mrf.mxu3  ;;  %947 = vmatmul.bf16.vlgmr.msrb.gmra.mxu1 %v355_v6  ;;  %v348_v12 = vmax.f32 %v326_v8, 0.0 }
  0xab   :  { %v339_v11 = vadd.f32 %v338_v9, %v65_v5  ;;  %v314_v13 = vpop.f32.mrf.mxu1 }
  0xac   :  { %v356_v15 = vpack.c.bf16 %v348_v12, %v348_v12 }
  0xad   :  { %v349_v14 = vmax.f32 %v339_v11, 0.0 }
  0xae   :  { %960 = vmatmul.bf16.vlgmr.msrb.gmra.mxu2 %v356_v15 }
  0xaf   :  { %v357_v16 = vpack.c.bf16 %v349_v14, %v349_v14  ;;  %v327_v17 = vpop.f32.mrf.mxu2 }
  0xb1   :  { %973 = vmatmul.bf16.vlgmr.msrb.gmra.mxu3 %v357_v16 }
  0xb2   :  { %v340_v18 = vpop.f32.mrf.mxu3 }
 0x115   :  { %v883_v19 = vpop.f32.mrf.mxu0 }
 0x116   :  { %v884_v22 = vadd.f32 %v1489_v21, %v883_v19 }
 0x117   :  { %v896_v20 = vpop.f32.mrf.mxu1 }
 0x118   :  { %v897_v25 = vadd.f32 %v896_v20, %v884_v22 }
 0x11d   :  { %v885_v23 = vpop.f32.mrf.mxu0 }
 0x11f   :  { %v898_v24 = vpop.f32.mrf.mxu1 }
 0x121   :  { %v909_v26 = vpop.f32.mrf.mxu2 }
 0x122   :  { %v910_v28 = vadd.f32 %v909_v26, %v897_v25 }
 0x124   :  { %v922_v27 = vpop.f32.mrf.mxu3 }
 0x125   :  { %v935_v29 = vpop.f32.mrf.mxu0  ;;  %v923_v31 = vadd.f32 %v922_v27, %v910_v28 }
 0x127   :  { %v948_v30 = vpop.f32.mrf.mxu1  ;;  %v936_v34 = vadd.f32 %v935_v29, %v923_v31 }
 0x129   :  { %v911_v32 = vpop.f32.mrf.mxu2  ;;  %v949_v37 = vadd.f32 %v948_v30, %v936_v34 }
 0x12c   :  { %v924_v33 = vpop.f32.mrf.mxu3 }
 0x12d   :  { %v937_v35 = vpop.f32.mrf.mxu0 }
 0x12f   :  { %v950_v36 = vpop.f32.mrf.mxu1 }
 0x131   :  { %v961_v38 = vpop.f32.mrf.mxu2 }
 0x132   :  { %v962_v39 = vadd.f32 %v961_v38, %v949_v37 }
 0x134   :  { %v974_v40 = vpop.f32.mrf.mxu3 }
 0x135   :  { %v975_v41 = vadd.f32 %v974_v40, %v962_v39 }
 0x137   :  { %979 = vst.msk [vmem:[#allocation2] sm:$0xff] %vm978_vm1, %v975_v41 }
 0x139   :  { %v963_v42 = vpop.f32.mrf.mxu2 }
 0x13c   :  { %v976_v43 = vpop.f32.mrf.mxu3 }
 0x13d   :  { %983 = vsyncadd [#allocation3], 96  ;;  %s986_s17 = sshll.u32 %s1968_s5, 4  ;;  %s1516_s0 = smov [#allocation2]   ;;  %s987_s17 = int_to_ptr.hbm [resolvable:$true] %s986_s17 }
 0x13e   :  { %s984_s18 = sshll.u32 %s1516_s0, 4  ;;  %s1517_s19 = smov 32   ;;  %s985_s18 = int_to_ptr.vmem [resolvable:$true] %s984_s18 }
 0x13f   :  { %s1518_s20 = smov 2  }
 0x140   :  { %992 = dma.vmem_to_hbm [thread:$0]  %s985_s18, 32, %s987_s17, [#allocation3], %s1517_s19, %s1517_s19, %s1518_s20  }
 0x141   :  { %1514 = dma.done.wait [#allocation3], 128  }
 0x142   :  { %1515 = vsyncadd [#allocation3], 4294967168 }
 0x143   :  { %997 = vsyncpa [#allocation3], 1 }

</bundles_post_ra>
